<compile_context>
chip_gen: v6e
topology: v6e:2x2x1
jax: 0.10.0
libtpu: 0.0.40
codegen_flags: <defaults>
</compile_context>

<pallas_src>
import math
import numpy as np
import jax
import jax.numpy as jnp
from jax import lax
from jax.experimental import pallas as pl
from jax.experimental.pallas import tpu as pltpu

_BN_EPS = 1e-5
_VMEM_HEADROOM = 16 * 1024 * 1024


def _tpu_vmem_capacity():
    try:
        return pltpu.get_tpu_info().vmem_capacity_bytes
    except Exception:
        return 64 * 1024 * 1024        # conservative (v7x per-core VMEM)


# ---------------------------------------------------------------------------
# Single fused kernel: spatial conv stack + channel MLP + gate apply.
# grid = (B, KC);  B "parallel", the C-tile axis is a reduction ("arbitrary").
# ---------------------------------------------------------------------------
def make_bam_kernel(C, Cr, H, W, S, TC, KC, num_layers, dil):
    # tap order must match both the precomputed masks and the weight stacking
    offsets = [dy * W + dx for dy in (-dil, 0, dil) for dx in (-dil, 0, dil)]

    def kernel(x_ref, masks_ref, w1_ref, b1_ref, wdil_ref, bdil_ref,
               wlast_ref, blast_ref,
               wm0_ref, bm0_ref, wm1_ref, bm1_ref, wm2_ref, bm2_ref,
               wm3_ref, bm3_ref,
               out_ref, acc_ref, gap_ref):
        ci = pl.program_id(1)
        xin = x_ref[0]                                   # (TC, S), io dtype
        x2 = xin.astype(jnp.float32)

        @pl.when(ci == 0)
        def _():
            acc_ref[...] = jnp.zeros_like(acc_ref)

        # conv_reduce1 (1x1 conv, BN folded): partial sum over this channel tile
        acc_ref[...] += jnp.dot(w1_ref[...], x2,
                                preferred_element_type=jnp.float32)

        # global average pool per channel (channel-attention input)
        gap_tile = jnp.mean(x2, axis=1, keepdims=True)   # (TC, 1)
        if KC == 1:
            gap_ref[...] = gap_tile
        else:
            start = pl.multiple_of(ci * TC, TC)
            gap_ref[pl.ds(start, TC), :] = gap_tile
            # stash x into the revolving fused output block; rescaled in place
            # at ci == KC - 1 (x is read from HBM exactly once).
            out_ref[0, pl.ds(start, TC), :] = xin

        @pl.when(ci == KC - 1)
        def _():
            # ---------------- channel attention MLP (BN folded) --------------
            g = gap_ref[...]                             # (C, 1)
            z = jnp.maximum(
                jnp.dot(wm0_ref[...], g, preferred_element_type=jnp.float32)
                + bm0_ref[...], 0.0)
            z = jnp.maximum(
                jnp.dot(wm1_ref[...], z, preferred_element_type=jnp.float32)
                + bm1_ref[...], 0.0)
            z = jnp.maximum(
                jnp.dot(wm2_ref[...], z, preferred_element_type=jnp.float32)
                + bm2_ref[...], 0.0)
            ca = (jnp.dot(wm3_ref[...], z, preferred_element_type=jnp.float32)
                  + bm3_ref[...])                        # (C, 1)

            # ---------------- spatial attention conv stack -------------------
            masks = masks_ref[...]                       # (9, S) f32 constants
            h = jnp.maximum(acc_ref[...] + b1_ref[...], 0.0)   # (Cr, S)
            for l in range(num_layers):
                # matmul-first: one (9*Cr, Cr) x (Cr, S) MXU matmul per layer,
                parts = jnp.dot(wdil_ref[l], h,
                                preferred_element_type=jnp.float32)  # (9Cr, S)
                acc = None
                # ...then 9 masked lane rotations (XLU slot) accumulated.
                for t, off in enumerate(offsets):
                    p = parts[t * Cr:(t + 1) * Cr, :]
                    if off != 0:
                        p = pltpu.roll(p, shift=(-off) % S, axis=1)
                        p = p * masks[t:t + 1, :]        # zero-padding mask
                    acc = p if acc is None else acc + p
                h = jnp.maximum(acc + bdil_ref[l], 0.0)  # (Cr, S)

            sa = (jnp.dot(wlast_ref[...], h, preferred_element_type=jnp.float32)
                  + blast_ref[...])                      # (1, S)

            # ---------------- fused gate apply: out = (1+sigmoid(sa+ca)) * x --
            if KC == 1:
                gate = 1.0 + pl.reciprocal(1.0 + jnp.exp(-(sa + ca)),
                                           approx=True)  # (C, S)
                out_ref[0] = (gate * x2).astype(out_ref.dtype)
            else:
                for cj in range(KC):                     # tile the apply
                    ca_t = ca[cj * TC:(cj + 1) * TC, :]
                    gate = 1.0 + pl.reciprocal(1.0 + jnp.exp(-(sa + ca_t)),
                                               approx=True)
                    xt = out_ref[0, cj * TC:(cj + 1) * TC, :].astype(jnp.float32)
                    out_ref[0, cj * TC:(cj + 1) * TC, :] = \
                        (gate * xt).astype(out_ref.dtype)

    return kernel


# ------------------------------- wrapper -----------------------------------
def _fold_bn(w, b, bn, eps=_BN_EPS):
    gamma, beta, mean, var = bn
    s = gamma / jnp.sqrt(var + eps)
    return w * s[:, None], s * (b - mean) + beta


def bam_forward(x, params, reduction=16, dia_val=2, num_layers=3,
                io_dtype=None):
    B, C, H, W = x.shape
    S = H * W
    Cr = C // reduction
    assert C % reduction == 0 and num_layers == 3
    if io_dtype is None:
        io_dtype = x.dtype

    # ---- BN folding / weight repacking (tiny tensors, glue only) ----
    w1f, b1f = _fold_bn(params['sa_conv1_w'][:, :, 0, 0],
                        params['sa_conv1_b'], params['sa_bn1'])
    b1f = b1f.reshape(Cr, 1)

    wdil_list, bdil_list = [], []
    for l in range(num_layers):
        gamma, beta, mean, var = params['sa_dil_bn'][l]
        s = gamma / jnp.sqrt(var + _BN_EPS)
        wlf = params['sa_dil_w'][l] * s[:, None, None, None]      # (Cr,Cr,3,3)
        blf = s * (params['sa_dil_b'][l] - mean) + beta
        # matmul-first stacking: Wstk[(ky*3+kx)*Cr + o, c] = W[o, c, ky, kx]
        wdil_list.append(jnp.transpose(wlf, (2, 3, 0, 1)).reshape(9 * Cr, Cr))
        bdil_list.append(blf.reshape(Cr, 1))
    wdil = jnp.stack(wdil_list)                                   # (L, 9Cr, Cr)
    bdil = jnp.stack(bdil_list)                                   # (L, Cr, 1)

    wlast = params['sa_last_w'][:, :, 0, 0]                       # (1, Cr)
    blast = params['sa_last_b'].reshape(1, 1)

    wm, bm = [], []
    for l in range(num_layers):
        wf, bf = _fold_bn(params['ca_fc_w'][l], params['ca_fc_b'][l],
                          params['ca_fc_bn'][l])
        wm.append(wf)
        bm.append(bf.reshape(-1, 1))
    wm3 = params['ca_last_w']                                     # (C, Cr)
    bm3 = params['ca_last_b'].reshape(C, 1)

    # ---- static boundary masks for the 9 dilated-conv taps (f32, (9, S)) ----
    lin = np.arange(S)
    row, col = lin // W, lin % W
    mrows = []
    for dy in (-dia_val, 0, dia_val):
        for dx in (-dia_val, 0, dia_val):
            m = ((row + dy >= 0) & (row + dy < H) &
                 (col + dx >= 0) & (col + dx < W))
            mrows.append(m.astype(np.float32))
    masks = jnp.asarray(np.stack(mrows))                          # (9, S)

    # ---- channel tiling: full-C tile when the per-batch working set fits ----
    vmem_cap = _tpu_vmem_capacity()
    budget = vmem_cap // 2 - 8 * 1024 * 1024
    work_set = (3 * C + 2 * Cr) * S * 4      # x dbl-buf + out block + transients
    if work_set <= budget or C % 128 != 0:
        TC = C                                # v5e/v6e typical: KC == 1
    else:
        TC = 256 if C % 256 == 0 else 128     # v7x / very large C*S
    KC = C // TC
    vmem_limit = max(32 * 1024 * 1024,
                     min(vmem_cap - _VMEM_HEADROOM, 64 * 1024 * 1024))

    xf = x.reshape(B, C, S).astype(io_dtype)

    full2 = lambda b, ci: (0, 0)
    full3 = lambda b, ci: (0, 0, 0)

    out = pl.pallas_call(
        make_bam_kernel(C, Cr, H, W, S, TC, KC, num_layers, dia_val),
        grid=(B, KC),
        in_specs=[
            pl.BlockSpec((1, TC, S), lambda b, ci: (b, ci, 0)),   # x
            pl.BlockSpec((9, S), full2),                          # tap masks
            pl.BlockSpec((Cr, TC), lambda b, ci: (0, ci)),        # 1x1 reduce W
            pl.BlockSpec((Cr, 1), full2),                         # 1x1 reduce b
            pl.BlockSpec((num_layers, 9 * Cr, Cr), full3),        # dilated W
            pl.BlockSpec((num_layers, Cr, 1), full3),             # dilated b
            pl.BlockSpec((1, Cr), full2),                         # last 1x1 W
            pl.BlockSpec((1, 1), full2),                          # last 1x1 b
            pl.BlockSpec((Cr, C), full2),                         # fc0 W
            pl.BlockSpec((Cr, 1), full2),                         # fc0 b
            pl.BlockSpec((Cr, Cr), full2),                        # fc1 W
            pl.BlockSpec((Cr, 1), full2),                         # fc1 b
            pl.BlockSpec((Cr, Cr), full2),                        # fc2 W
            pl.BlockSpec((Cr, 1), full2),                         # fc2 b
            pl.BlockSpec((C, Cr), full2),                         # last fc W
            pl.BlockSpec((C, 1), full2),                          # last fc b
        ],
        out_specs=pl.BlockSpec((1, C, S), lambda b, ci: (b, 0, 0)),
        out_shape=jax.ShapeDtypeStruct((B, C, S), io_dtype),
        scratch_shapes=[
            pltpu.VMEM((Cr, S), jnp.float32),                     # 1x1-conv acc
            pltpu.VMEM((C, 1), jnp.float32),                      # GAP vector
        ],
        compiler_params=pltpu.CompilerParams(
            dimension_semantics=("parallel", "arbitrary"),
            vmem_limit_bytes=vmem_limit),
    )(xf, masks, w1f, b1f, wdil, bdil, wlast, blast,
      wm[0], bm[0], wm[1], bm[1], wm[2], bm[2], wm3, bm3)

    return out.reshape(B, C, H, W)


# --------------------- pure-JAX reference (for checking) -------------------
def bam_reference(x, params, reduction=16, dia_val=2, num_layers=3):
    eps = _BN_EPS

    def bn2d(v, bn):
        g, b, m, var = bn
        return ((v - m[None, :, None, None]) /
                jnp.sqrt(var[None, :, None, None] + eps)
                * g[None, :, None, None] + b[None, :, None, None])

    def bn1d(v, bn):
        g, b, m, var = bn
        return (v - m[None, :]) / jnp.sqrt(var[None, :] + eps) * g[None, :] + b[None, :]

    # spatial attention
    h = (jnp.einsum('oc,bchw->bohw', params['sa_conv1_w'][:, :, 0, 0], x)
         + params['sa_conv1_b'][None, :, None, None])
    h = jax.nn.relu(bn2d(h, params['sa_bn1']))
    for l in range(num_layers):
        h = lax.conv_general_dilated(
            h, params['sa_dil_w'][l], window_strides=(1, 1),
            padding=((dia_val, dia_val), (dia_val, dia_val)),
            rhs_dilation=(dia_val, dia_val),
            dimension_numbers=('NCHW', 'OIHW', 'NCHW'))
        h = h + params['sa_dil_b'][l][None, :, None, None]
        h = jax.nn.relu(bn2d(h, params['sa_dil_bn'][l]))
    sa = (jnp.einsum('oc,bchw->bohw', params['sa_last_w'][:, :, 0, 0], h)
          + params['sa_last_b'][None, :, None, None])            # (B,1,H,W)

    # channel attention
    z = jnp.mean(x, axis=(2, 3))                                  # (B, C)
    for l in range(num_layers):
        z = z @ params['ca_fc_w'][l].T + params['ca_fc_b'][l][None, :]
        z = jax.nn.relu(bn1d(z, params['ca_fc_bn'][l]))
    ca = z @ params['ca_last_w'].T + params['ca_last_b'][None, :]  # (B, C)

    weight = jax.nn.sigmoid(sa + ca[:, :, None, None])
    return (1.0 + weight) * x


def init_params(key, C, reduction=16, num_layers=3):
    Cr = C // reduction
    keys = iter(jax.random.split(key, 64))

    def w(shape, scale):
        return jax.random.normal(next(keys), shape, jnp.float32) * scale

    def bn(n):
        gamma = 1.0 + 0.1 * jax.random.normal(next(keys), (n,), jnp.float32)
        beta = 0.1 * jax.random.normal(next(keys), (n,), jnp.float32)
        mean = 0.1 * jax.random.normal(next(keys), (n,), jnp.float32)
        var = jax.random.uniform(next(keys), (n,), jnp.float32, 0.5, 1.5)
        return (gamma, beta, mean, var)

    p = {}
    p['sa_conv1_w'] = w((Cr, C, 1, 1), 1.0 / math.sqrt(C))
    p['sa_conv1_b'] = w((Cr,), 0.1)
    p['sa_bn1'] = bn(Cr)
    p['sa_dil_w'] = [w((Cr, Cr, 3, 3), 1.0 / math.sqrt(9 * Cr)) for _ in range(num_layers)]
    p['sa_dil_b'] = [w((Cr,), 0.1) for _ in range(num_layers)]
    p['sa_dil_bn'] = [bn(Cr) for _ in range(num_layers)]
    p['sa_last_w'] = w((1, Cr, 1, 1), 1.0 / math.sqrt(Cr))
    p['sa_last_b'] = w((1,), 0.1)
    fc_in = [C, Cr, Cr]
    p['ca_fc_w'] = [w((Cr, fc_in[l]), 1.0 / math.sqrt(fc_in[l])) for l in range(num_layers)]
    p['ca_fc_b'] = [w((Cr,), 0.1) for _ in range(num_layers)]
    p['ca_fc_bn'] = [bn(Cr) for _ in range(num_layers)]
    p['ca_last_w'] = w((C, Cr), 1.0 / math.sqrt(Cr))
    p['ca_last_b'] = w((C,), 0.1)
    return p


if __name__ == "__main__":
    B, C, H, W = 2, 64, 16, 16
    reduction, dia_val, num_layers = 16, 2, 3

    key = jax.random.PRNGKey(0)
    kx, kp = jax.random.split(key)
    x = jax.random.normal(kx, (B, C, H, W), dtype=jnp.float32)
    params = init_params(kp, C, reduction, num_layers)

    out = bam_forward(x, params, reduction, dia_val, num_layers)
    out = jax.block_until_ready(out)

    with jax.default_matmul_precision("float32"):
        ref = bam_reference(x, params, reduction, dia_val, num_layers)
    ref = jax.block_until_ready(ref)

    assert out.shape == x.shape
    np.testing.assert_allclose(np.asarray(out), np.asarray(ref),
                               rtol=2e-2, atol=2e-2)
    print("KERNEL_OK")
</pallas_src>

<mosaic_0001>
module attributes {stable_mosaic.version = 11 : i64} {
  func.func @kernel(%arg0: i32, %arg1: i32, %arg2: memref<1x64x256xf32, #tpu.memory_space<vmem>>, %arg3: memref<9x256xf32, #tpu.memory_space<vmem>>, %arg4: memref<4x64xf32, #tpu.memory_space<vmem>>, %arg5: memref<4x1xf32, #tpu.memory_space<vmem>>, %arg6: memref<3x36x4xf32, #tpu.memory_space<vmem>>, %arg7: memref<3x4x1xf32, #tpu.memory_space<vmem>>, %arg8: memref<1x4xf32, #tpu.memory_space<vmem>>, %arg9: memref<1x1xf32, #tpu.memory_space<vmem>>, %arg10: memref<4x64xf32, #tpu.memory_space<vmem>>, %arg11: memref<4x1xf32, #tpu.memory_space<vmem>>, %arg12: memref<4x4xf32, #tpu.memory_space<vmem>>, %arg13: memref<4x1xf32, #tpu.memory_space<vmem>>, %arg14: memref<4x4xf32, #tpu.memory_space<vmem>>, %arg15: memref<4x1xf32, #tpu.memory_space<vmem>>, %arg16: memref<64x4xf32, #tpu.memory_space<vmem>>, %arg17: memref<64x1xf32, #tpu.memory_space<vmem>>, %arg18: memref<1x64x256xf32, #tpu.memory_space<vmem>>, %arg19: memref<4x256xf32, #tpu.memory_space<vmem>>, %arg20: memref<64x1xf32, #tpu.memory_space<vmem>>) attributes {dimension_semantics = [#tpu.dimension_semantics<parallel>, #tpu.dimension_semantics<arbitrary>], iteration_bounds = array<i64: 2, 1>, scalar_prefetch = 0 : i64, scratch_operands = 2 : i64, tpu.core_type = #tpu.core_type<tc>, window_params = [{transform_indices = @transform_0, window_bounds = array<i64: 1, 64, 256>}, {pipeline_mode = #tpu.pipeline_mode<synchronous>, transform_indices = @transform_1, window_bounds = array<i64: 9, 256>}, {transform_indices = @transform_2, window_bounds = array<i64: 4, 64>}, {pipeline_mode = #tpu.pipeline_mode<synchronous>, transform_indices = @transform_3, window_bounds = array<i64: 4, 1>}, {pipeline_mode = #tpu.pipeline_mode<synchronous>, transform_indices = @transform_4, window_bounds = array<i64: 3, 36, 4>}, {pipeline_mode = #tpu.pipeline_mode<synchronous>, transform_indices = @transform_5, window_bounds = array<i64: 3, 4, 1>}, {pipeline_mode = #tpu.pipeline_mode<synchronous>, transform_indices = @transform_6, window_bounds = array<i64: 1, 4>}, {pipeline_mode = #tpu.pipeline_mode<synchronous>, transform_indices = @transform_7, window_bounds = array<i64: 1, 1>}, {pipeline_mode = #tpu.pipeline_mode<synchronous>, transform_indices = @transform_8, window_bounds = array<i64: 4, 64>}, {pipeline_mode = #tpu.pipeline_mode<synchronous>, transform_indices = @transform_9, window_bounds = array<i64: 4, 1>}, {pipeline_mode = #tpu.pipeline_mode<synchronous>, transform_indices = @transform_10, window_bounds = array<i64: 4, 4>}, {pipeline_mode = #tpu.pipeline_mode<synchronous>, transform_indices = @transform_11, window_bounds = array<i64: 4, 1>}, {pipeline_mode = #tpu.pipeline_mode<synchronous>, transform_indices = @transform_12, window_bounds = array<i64: 4, 4>}, {pipeline_mode = #tpu.pipeline_mode<synchronous>, transform_indices = @transform_13, window_bounds = array<i64: 4, 1>}, {pipeline_mode = #tpu.pipeline_mode<synchronous>, transform_indices = @transform_14, window_bounds = array<i64: 64, 4>}, {pipeline_mode = #tpu.pipeline_mode<synchronous>, transform_indices = @transform_15, window_bounds = array<i64: 64, 1>}, {transform_indices = @transform_16, window_bounds = array<i64: 1, 64, 256>}]} {
    %c0 = arith.constant 0 : index
    %c0_0 = arith.constant 0 : index
    %c0_1 = arith.constant 0 : index
    %0 = vector.load %arg2[%c0, %c0_0, %c0_1] : memref<1x64x256xf32, #tpu.memory_space<vmem>>, vector<1x64x256xf32>
    %1 = vector.shape_cast %0 : vector<1x64x256xf32> to vector<64x256xf32>
    %c0_i32 = arith.constant 0 : i32
    %2 = arith.cmpi eq, %arg1, %c0_i32 : i32
    %3 = arith.extui %2 : i1 to i32
    %c0_i32_2 = arith.constant 0 : i32
    %4 = arith.cmpi ne, %3, %c0_i32_2 : i32
    scf.if %4 {
      %cst_15 = arith.constant 0.000000e+00 : f32
      %18 = vector.broadcast %cst_15 : f32 to vector<4x256xf32>
      %c0_16 = arith.constant 0 : index
      %c0_17 = arith.constant 0 : index
      %19 = vector.load %arg19[%c0_16, %c0_17] : memref<4x256xf32, #tpu.memory_space<vmem>>, vector<4x256xf32>
      tpu.vector_store %arg19[%c0_16, %c0_17], %18 {strides = array<i32>} : memref<4x256xf32, #tpu.memory_space<vmem>>, vector<4x256xf32>,
    } else {
    }
    %c0_3 = arith.constant 0 : index
    %c0_4 = arith.constant 0 : index
    %5 = vector.load %arg19[%c0_3, %c0_4] : memref<4x256xf32, #tpu.memory_space<vmem>>, vector<4x256xf32>
    %c0_5 = arith.constant 0 : index
    %c0_6 = arith.constant 0 : index
    %6 = vector.load %arg4[%c0_5, %c0_6] : memref<4x64xf32, #tpu.memory_space<vmem>>, vector<4x64xf32>
    %cst = arith.constant dense<0.000000e+00> : vector<4x256xf32>
    %7 = tpu.matmul %6, %1, %cst {dimension_numbers = #tpu.dot_dimension_numbers<[1], [0], [0], [1], [0, 0, 1, 1], [], []>} : vector<4x64xf32>, vector<64x256xf32>, vector<4x256xf32> -> vector<4x256xf32>
    %8 = arith.addf %5, %7 : vector<4x256xf32>
    %c0_7 = arith.constant 0 : index
    %c0_8 = arith.constant 0 : index
    %9 = vector.load %arg19[%c0_7, %c0_8] : memref<4x256xf32, #tpu.memory_space<vmem>>, vector<4x256xf32>
    tpu.vector_store %arg19[%c0_7, %c0_8], %8 {strides = array<i32>} : memref<4x256xf32, #tpu.memory_space<vmem>>, vector<4x256xf32>,
    %cst_9 = arith.constant dense<0.000000e+00> : vector<64xf32>
    %10 = vector.multi_reduction <add>, %1, %cst_9 [1] : vector<64x256xf32> to vector<64xf32>
    %11 = vector.shape_cast %10 : vector<64xf32> to vector<64x1xf32>
    %cst_10 = arith.constant 2.560000e+02 : f32
    %12 = vector.broadcast %cst_10 : f32 to vector<64x1xf32>
    %13 = arith.divf %11, %12 : vector<64x1xf32>
    %c0_11 = arith.constant 0 : index
    %c0_12 = arith.constant 0 : index
    %14 = vector.load %arg20[%c0_11, %c0_12] : memref<64x1xf32, #tpu.memory_space<vmem>>, vector<64x1xf32>
    tpu.vector_store %arg20[%c0_11, %c0_12], %13 {strides = array<i32>} : memref<64x1xf32, #tpu.memory_space<vmem>>, vector<64x1xf32>,
    %c0_i32_13 = arith.constant 0 : i32
    %15 = arith.cmpi eq, %arg1, %c0_i32_13 : i32
    %16 = arith.extui %15 : i1 to i32
    %c0_i32_14 = arith.constant 0 : i32
    %17 = arith.cmpi ne, %16, %c0_i32_14 : i32
    scf.if %17 {
      %c0_15 = arith.constant 0 : index
      %c0_16 = arith.constant 0 : index
      %18 = vector.load %arg20[%c0_15, %c0_16] : memref<64x1xf32, #tpu.memory_space<vmem>>, vector<64x1xf32>
      %c0_17 = arith.constant 0 : index
      %c0_18 = arith.constant 0 : index
      %19 = vector.load %arg10[%c0_17, %c0_18] : memref<4x64xf32, #tpu.memory_space<vmem>>, vector<4x64xf32>
      %cst_19 = arith.constant dense<0.000000e+00> : vector<4x1xf32>
      %20 = tpu.matmul %19, %18, %cst_19 {dimension_numbers = #tpu.dot_dimension_numbers<[1], [0], [0], [1], [0, 0, 1, 1], [], []>} : vector<4x64xf32>, vector<64x1xf32>, vector<4x1xf32> -> vector<4x1xf32>
      %c0_20 = arith.constant 0 : index
      %c0_21 = arith.constant 0 : index
      %21 = vector.load %arg11[%c0_20, %c0_21] : memref<4x1xf32, #tpu.memory_space<vmem>>, vector<4x1xf32>
      %22 = arith.addf %20, %21 : vector<4x1xf32>
      %cst_22 = arith.constant 0.000000e+00 : f32
      %23 = vector.broadcast %cst_22 : f32 to vector<4x1xf32>
      %24 = arith.maximumf %22, %23 : vector<4x1xf32>
      %c0_23 = arith.constant 0 : index
      %c0_24 = arith.constant 0 : index
      %25 = vector.load %arg12[%c0_23, %c0_24] : memref<4x4xf32, #tpu.memory_space<vmem>>, vector<4x4xf32>
      %cst_25 = arith.constant dense<0.000000e+00> : vector<4x1xf32>
      %26 = tpu.matmul %25, %24, %cst_25 {dimension_numbers = #tpu.dot_dimension_numbers<[1], [0], [0], [1], [0, 0, 1, 1], [], []>} : vector<4x4xf32>, vector<4x1xf32>, vector<4x1xf32> -> vector<4x1xf32>
      %c0_26 = arith.constant 0 : index
      %c0_27 = arith.constant 0 : index
      %27 = vector.load %arg13[%c0_26, %c0_27] : memref<4x1xf32, #tpu.memory_space<vmem>>, vector<4x1xf32>
      %28 = arith.addf %26, %27 : vector<4x1xf32>
      %cst_28 = arith.constant 0.000000e+00 : f32
      %29 = vector.broadcast %cst_28 : f32 to vector<4x1xf32>
      %30 = arith.maximumf %28, %29 : vector<4x1xf32>
      %c0_29 = arith.constant 0 : index
      %c0_30 = arith.constant 0 : index
      %31 = vector.load %arg14[%c0_29, %c0_30] : memref<4x4xf32, #tpu.memory_space<vmem>>, vector<4x4xf32>
      %cst_31 = arith.constant dense<0.000000e+00> : vector<4x1xf32>
      %32 = tpu.matmul %31, %30, %cst_31 {dimension_numbers = #tpu.dot_dimension_numbers<[1], [0], [0], [1], [0, 0, 1, 1], [], []>} : vector<4x4xf32>, vector<4x1xf32>, vector<4x1xf32> -> vector<4x1xf32>
      %c0_32 = arith.constant 0 : index
      %c0_33 = arith.constant 0 : index
      %33 = vector.load %arg15[%c0_32, %c0_33] : memref<4x1xf32, #tpu.memory_space<vmem>>, vector<4x1xf32>
      %34 = arith.addf %32, %33 : vector<4x1xf32>
      %cst_34 = arith.constant 0.000000e+00 : f32
      %35 = vector.broadcast %cst_34 : f32 to vector<4x1xf32>
      %36 = arith.maximumf %34, %35 : vector<4x1xf32>
      %c0_35 = arith.constant 0 : index
      %c0_36 = arith.constant 0 : index
      %37 = vector.load %arg16[%c0_35, %c0_36] : memref<64x4xf32, #tpu.memory_space<vmem>>, vector<64x4xf32>
      %cst_37 = arith.constant dense<0.000000e+00> : vector<64x1xf32>
      %38 = tpu.matmul %37, %36, %cst_37 {dimension_numbers = #tpu.dot_dimension_numbers<[1], [0], [0], [1], [0, 0, 1, 1], [], []>} : vector<64x4xf32>, vector<4x1xf32>, vector<64x1xf32> -> vector<64x1xf32>
      %c0_38 = arith.constant 0 : index
      %c0_39 = arith.constant 0 : index
      %39 = vector.load %arg17[%c0_38, %c0_39] : memref<64x1xf32, #tpu.memory_space<vmem>>, vector<64x1xf32>
      %40 = arith.addf %38, %39 : vector<64x1xf32>
      %c0_40 = arith.constant 0 : index
      %c0_41 = arith.constant 0 : index
      %41 = vector.load %arg3[%c0_40, %c0_41] : memref<9x256xf32, #tpu.memory_space<vmem>>, vector<9x256xf32>
      %c0_42 = arith.constant 0 : index
      %c0_43 = arith.constant 0 : index
      %42 = vector.load %arg19[%c0_42, %c0_43] : memref<4x256xf32, #tpu.memory_space<vmem>>, vector<4x256xf32>
      %c0_44 = arith.constant 0 : index
      %c0_45 = arith.constant 0 : index
      %43 = vector.load %arg5[%c0_44, %c0_45] : memref<4x1xf32, #tpu.memory_space<vmem>>, vector<4x1xf32>
      %44 = vector.broadcast %43 : vector<4x1xf32> to vector<4x256xf32>
      %45 = arith.addf %42, %44 : vector<4x256xf32>
      %cst_46 = arith.constant 0.000000e+00 : f32
      %46 = vector.broadcast %cst_46 : f32 to vector<4x256xf32>
      %47 = arith.maximumf %45, %46 : vector<4x256xf32>
      %c0_47 = arith.constant 0 : index
      %c0_48 = arith.constant 0 : index
      %c0_49 = arith.constant 0 : index
      %48 = vector.load %arg6[%c0_47, %c0_48, %c0_49] : memref<3x36x4xf32, #tpu.memory_space<vmem>>, vector<1x36x4xf32>
      %49 = vector.shape_cast %48 : vector<1x36x4xf32> to vector<36x4xf32>
      %cst_50 = arith.constant dense<0.000000e+00> : vector<36x256xf32>
      %50 = tpu.matmul %49, %47, %cst_50 {dimension_numbers = #tpu.dot_dimension_numbers<[1], [0], [0], [1], [0, 0, 1, 1], [], []>} : vector<36x4xf32>, vector<4x256xf32>, vector<36x256xf32> -> vector<36x256xf32>
      %51 = vector.extract_strided_slice %50 {offsets = [0, 0], sizes = [4, 256], strides = [1, 1]} : vector<36x256xf32> to vector<4x256xf32>
      %c34_i32 = arith.constant 34 : i32
      %52 = tpu.dynamic_rotate %51 by %c34_i32 dim 1 : vector<4x256xf32>, i32 -> vector<4x256xf32>
      %53 = vector.extract_strided_slice %41 {offsets = [0, 0], sizes = [1, 256], strides = [1, 1]} : vector<9x256xf32> to vector<1x256xf32>
      %54 = vector.broadcast %53 : vector<1x256xf32> to vector<4x256xf32>
      %55 = arith.mulf %52, %54 : vector<4x256xf32>
      %56 = vector.extract_strided_slice %50 {offsets = [4, 0], sizes = [4, 256], strides = [1, 1]} : vector<36x256xf32> to vector<4x256xf32>
      %c32_i32 = arith.constant 32 : i32
      %57 = tpu.dynamic_rotate %56 by %c32_i32 dim 1 : vector<4x256xf32>, i32 -> vector<4x256xf32>
      %58 = vector.extract_strided_slice %41 {offsets = [1, 0], sizes = [1, 256], strides = [1, 1]} : vector<9x256xf32> to vector<1x256xf32>
      %59 = vector.broadcast %58 : vector<1x256xf32> to vector<4x256xf32>
      %60 = arith.mulf %57, %59 : vector<4x256xf32>
      %61 = arith.addf %55, %60 : vector<4x256xf32>
      %62 = vector.extract_strided_slice %50 {offsets = [8, 0], sizes = [4, 256], strides = [1, 1]} : vector<36x256xf32> to vector<4x256xf32>
      %c30_i32 = arith.constant 30 : i32
      %63 = tpu.dynamic_rotate %62 by %c30_i32 dim 1 : vector<4x256xf32>, i32 -> vector<4x256xf32>
      %64 = vector.extract_strided_slice %41 {offsets = [2, 0], sizes = [1, 256], strides = [1, 1]} : vector<9x256xf32> to vector<1x256xf32>
      %65 = vector.broadcast %64 : vector<1x256xf32> to vector<4x256xf32>
      %66 = arith.mulf %63, %65 : vector<4x256xf32>
      %67 = arith.addf %61, %66 : vector<4x256xf32>
      %68 = vector.extract_strided_slice %50 {offsets = [12, 0], sizes = [4, 256], strides = [1, 1]} : vector<36x256xf32> to vector<4x256xf32>
      %c2_i32 = arith.constant 2 : i32
      %69 = tpu.dynamic_rotate %68 by %c2_i32 dim 1 : vector<4x256xf32>, i32 -> vector<4x256xf32>
      %70 = vector.extract_strided_slice %41 {offsets = [3, 0], sizes = [1, 256], strides = [1, 1]} : vector<9x256xf32> to vector<1x256xf32>
      %71 = vector.broadcast %70 : vector<1x256xf32> to vector<4x256xf32>
      %72 = arith.mulf %69, %71 : vector<4x256xf32>
      %73 = arith.addf %67, %72 : vector<4x256xf32>
      %74 = vector.extract_strided_slice %50 {offsets = [16, 0], sizes = [4, 256], strides = [1, 1]} : vector<36x256xf32> to vector<4x256xf32>
      %75 = arith.addf %73, %74 : vector<4x256xf32>
      %76 = vector.extract_strided_slice %50 {offsets = [20, 0], sizes = [4, 256], strides = [1, 1]} : vector<36x256xf32> to vector<4x256xf32>
      %c254_i32 = arith.constant 254 : i32
      %77 = tpu.dynamic_rotate %76 by %c254_i32 dim 1 : vector<4x256xf32>, i32 -> vector<4x256xf32>
      %78 = vector.extract_strided_slice %41 {offsets = [5, 0], sizes = [1, 256], strides = [1, 1]} : vector<9x256xf32> to vector<1x256xf32>
      %79 = vector.broadcast %78 : vector<1x256xf32> to vector<4x256xf32>
      %80 = arith.mulf %77, %79 : vector<4x256xf32>
      %81 = arith.addf %75, %80 : vector<4x256xf32>
      %82 = vector.extract_strided_slice %50 {offsets = [24, 0], sizes = [4, 256], strides = [1, 1]} : vector<36x256xf32> to vector<4x256xf32>
      %c226_i32 = arith.constant 226 : i32
      %83 = tpu.dynamic_rotate %82 by %c226_i32 dim 1 : vector<4x256xf32>, i32 -> vector<4x256xf32>
      %84 = vector.extract_strided_slice %41 {offsets = [6, 0], sizes = [1, 256], strides = [1, 1]} : vector<9x256xf32> to vector<1x256xf32>
      %85 = vector.broadcast %84 : vector<1x256xf32> to vector<4x256xf32>
      %86 = arith.mulf %83, %85 : vector<4x256xf32>
      %87 = arith.addf %81, %86 : vector<4x256xf32>
      %88 = vector.extract_strided_slice %50 {offsets = [28, 0], sizes = [4, 256], strides = [1, 1]} : vector<36x256xf32> to vector<4x256xf32>
      %c224_i32 = arith.constant 224 : i32
      %89 = tpu.dynamic_rotate %88 by %c224_i32 dim 1 : vector<4x256xf32>, i32 -> vector<4x256xf32>
      %90 = vector.extract_strided_slice %41 {offsets = [7, 0], sizes = [1, 256], strides = [1, 1]} : vector<9x256xf32> to vector<1x256xf32>
      %91 = vector.broadcast %90 : vector<1x256xf32> to vector<4x256xf32>
      %92 = arith.mulf %89, %91 : vector<4x256xf32>
      %93 = arith.addf %87, %92 : vector<4x256xf32>
      %94 = vector.extract_strided_slice %50 {offsets = [32, 0], sizes = [4, 256], strides = [1, 1]} : vector<36x256xf32> to vector<4x256xf32>
      %c222_i32 = arith.constant 222 : i32
      %95 = tpu.dynamic_rotate %94 by %c222_i32 dim 1 : vector<4x256xf32>, i32 -> vector<4x256xf32>
      %96 = vector.extract_strided_slice %41 {offsets = [8, 0], sizes = [1, 256], strides = [1, 1]} : vector<9x256xf32> to vector<1x256xf32>
      %97 = vector.broadcast %96 : vector<1x256xf32> to vector<4x256xf32>
      %98 = arith.mulf %95, %97 : vector<4x256xf32>
      %99 = arith.addf %93, %98 : vector<4x256xf32>
      %c0_51 = arith.constant 0 : index
      %c0_52 = arith.constant 0 : index
      %c0_53 = arith.constant 0 : index
      %100 = vector.load %arg7[%c0_51, %c0_52, %c0_53] : memref<3x4x1xf32, #tpu.memory_space<vmem>>, vector<1x4x1xf32>
      %101 = vector.shape_cast %100 : vector<1x4x1xf32> to vector<4x1xf32>
      %102 = vector.broadcast %101 : vector<4x1xf32> to vector<4x256xf32>
      %103 = arith.addf %99, %102 : vector<4x256xf32>
      %cst_54 = arith.constant 0.000000e+00 : f32
      %104 = vector.broadcast %cst_54 : f32 to vector<4x256xf32>
      %105 = arith.maximumf %103, %104 : vector<4x256xf32>
      %c1 = arith.constant 1 : index
      %c0_55 = arith.constant 0 : index
      %c0_56 = arith.constant 0 : index
      %106 = vector.load %arg6[%c1, %c0_55, %c0_56] : memref<3x36x4xf32, #tpu.memory_space<vmem>>, vector<1x36x4xf32>
      %107 = vector.shape_cast %106 : vector<1x36x4xf32> to vector<36x4xf32>
      %cst_57 = arith.constant dense<0.000000e+00> : vector<36x256xf32>
      %108 = tpu.matmul %107, %105, %cst_57 {dimension_numbers = #tpu.dot_dimension_numbers<[1], [0], [0], [1], [0, 0, 1, 1], [], []>} : vector<36x4xf32>, vector<4x256xf32>, vector<36x256xf32> -> vector<36x256xf32>
      %109 = vector.extract_strided_slice %108 {offsets = [0, 0], sizes = [4, 256], strides = [1, 1]} : vector<36x256xf32> to vector<4x256xf32>
      %c34_i32_58 = arith.constant 34 : i32
      %110 = tpu.dynamic_rotate %109 by %c34_i32_58 dim 1 : vector<4x256xf32>, i32 -> vector<4x256xf32>
      %111 = vector.extract_strided_slice %41 {offsets = [0, 0], sizes = [1, 256], strides = [1, 1]} : vector<9x256xf32> to vector<1x256xf32>
      %112 = vector.broadcast %111 : vector<1x256xf32> to vector<4x256xf32>
      %113 = arith.mulf %110, %112 : vector<4x256xf32>
      %114 = vector.extract_strided_slice %108 {offsets = [4, 0], sizes = [4, 256], strides = [1, 1]} : vector<36x256xf32> to vector<4x256xf32>
      %c32_i32_59 = arith.constant 32 : i32
      %115 = tpu.dynamic_rotate %114 by %c32_i32_59 dim 1 : vector<4x256xf32>, i32 -> vector<4x256xf32>
      %116 = vector.extract_strided_slice %41 {offsets = [1, 0], sizes = [1, 256], strides = [1, 1]} : vector<9x256xf32> to vector<1x256xf32>
      %117 = vector.broadcast %116 : vector<1x256xf32> to vector<4x256xf32>
      %118 = arith.mulf %115, %117 : vector<4x256xf32>
      %119 = arith.addf %113, %118 : vector<4x256xf32>
      %120 = vector.extract_strided_slice %108 {offsets = [8, 0], sizes = [4, 256], strides = [1, 1]} : vector<36x256xf32> to vector<4x256xf32>
      %c30_i32_60 = arith.constant 30 : i32
      %121 = tpu.dynamic_rotate %120 by %c30_i32_60 dim 1 : vector<4x256xf32>, i32 -> vector<4x256xf32>
      %122 = vector.extract_strided_slice %41 {offsets = [2, 0], sizes = [1, 256], strides = [1, 1]} : vector<9x256xf32> to vector<1x256xf32>
      %123 = vector.broadcast %122 : vector<1x256xf32> to vector<4x256xf32>
      %124 = arith.mulf %121, %123 : vector<4x256xf32>
      %125 = arith.addf %119, %124 : vector<4x256xf32>
      %126 = vector.extract_strided_slice %108 {offsets = [12, 0], sizes = [4, 256], strides = [1, 1]} : vector<36x256xf32> to vector<4x256xf32>
      %c2_i32_61 = arith.constant 2 : i32
      %127 = tpu.dynamic_rotate %126 by %c2_i32_61 dim 1 : vector<4x256xf32>, i32 -> vector<4x256xf32>
      %128 = vector.extract_strided_slice %41 {offsets = [3, 0], sizes = [1, 256], strides = [1, 1]} : vector<9x256xf32> to vector<1x256xf32>
      %129 = vector.broadcast %128 : vector<1x256xf32> to vector<4x256xf32>
      %130 = arith.mulf %127, %129 : vector<4x256xf32>
      %131 = arith.addf %125, %130 : vector<4x256xf32>
      %132 = vector.extract_strided_slice %108 {offsets = [16, 0], sizes = [4, 256], strides = [1, 1]} : vector<36x256xf32> to vector<4x256xf32>
      %133 = arith.addf %131, %132 : vector<4x256xf32>
      %134 = vector.extract_strided_slice %108 {offsets = [20, 0], sizes = [4, 256], strides = [1, 1]} : vector<36x256xf32> to vector<4x256xf32>
      %c254_i32_62 = arith.constant 254 : i32
      %135 = tpu.dynamic_rotate %134 by %c254_i32_62 dim 1 : vector<4x256xf32>, i32 -> vector<4x256xf32>
      %136 = vector.extract_strided_slice %41 {offsets = [5, 0], sizes = [1, 256], strides = [1, 1]} : vector<9x256xf32> to vector<1x256xf32>
      %137 = vector.broadcast %136 : vector<1x256xf32> to vector<4x256xf32>
      %138 = arith.mulf %135, %137 : vector<4x256xf32>
      %139 = arith.addf %133, %138 : vector<4x256xf32>
      %140 = vector.extract_strided_slice %108 {offsets = [24, 0], sizes = [4, 256], strides = [1, 1]} : vector<36x256xf32> to vector<4x256xf32>
      %c226_i32_63 = arith.constant 226 : i32
      %141 = tpu.dynamic_rotate %140 by %c226_i32_63 dim 1 : vector<4x256xf32>, i32 -> vector<4x256xf32>
      %142 = vector.extract_strided_slice %41 {offsets = [6, 0], sizes = [1, 256], strides = [1, 1]} : vector<9x256xf32> to vector<1x256xf32>
      %143 = vector.broadcast %142 : vector<1x256xf32> to vector<4x256xf32>
      %144 = arith.mulf %141, %143 : vector<4x256xf32>
      %145 = arith.addf %139, %144 : vector<4x256xf32>
      %146 = vector.extract_strided_slice %108 {offsets = [28, 0], sizes = [4, 256], strides = [1, 1]} : vector<36x256xf32> to vector<4x256xf32>
      %c224_i32_64 = arith.constant 224 : i32
      %147 = tpu.dynamic_rotate %146 by %c224_i32_64 dim 1 : vector<4x256xf32>, i32 -> vector<4x256xf32>
      %148 = vector.extract_strided_slice %41 {offsets = [7, 0], sizes = [1, 256], strides = [1, 1]} : vector<9x256xf32> to vector<1x256xf32>
      %149 = vector.broadcast %148 : vector<1x256xf32> to vector<4x256xf32>
      %150 = arith.mulf %147, %149 : vector<4x256xf32>
      %151 = arith.addf %145, %150 : vector<4x256xf32>
      %152 = vector.extract_strided_slice %108 {offsets = [32, 0], sizes = [4, 256], strides = [1, 1]} : vector<36x256xf32> to vector<4x256xf32>
      %c222_i32_65 = arith.constant 222 : i32
      %153 = tpu.dynamic_rotate %152 by %c222_i32_65 dim 1 : vector<4x256xf32>, i32 -> vector<4x256xf32>
      %154 = vector.extract_strided_slice %41 {offsets = [8, 0], sizes = [1, 256], strides = [1, 1]} : vector<9x256xf32> to vector<1x256xf32>
      %155 = vector.broadcast %154 : vector<1x256xf32> to vector<4x256xf32>
      %156 = arith.mulf %153, %155 : vector<4x256xf32>
      %157 = arith.addf %151, %156 : vector<4x256xf32>
      %c1_66 = arith.constant 1 : index
      %c0_67 = arith.constant 0 : index
      %c0_68 = arith.constant 0 : index
      %158 = vector.load %arg7[%c1_66, %c0_67, %c0_68] : memref<3x4x1xf32, #tpu.memory_space<vmem>>, vector<1x4x1xf32>
      %159 = vector.shape_cast %158 : vector<1x4x1xf32> to vector<4x1xf32>
      %160 = vector.broadcast %159 : vector<4x1xf32> to vector<4x256xf32>
      %161 = arith.addf %157, %160 : vector<4x256xf32>
      %cst_69 = arith.constant 0.000000e+00 : f32
      %162 = vector.broadcast %cst_69 : f32 to vector<4x256xf32>
      %163 = arith.maximumf %161, %162 : vector<4x256xf32>
      %c2 = arith.constant 2 : index
      %c0_70 = arith.constant 0 : index
      %c0_71 = arith.constant 0 : index
      %164 = vector.load %arg6[%c2, %c0_70, %c0_71] : memref<3x36x4xf32, #tpu.memory_space<vmem>>, vector<1x36x4xf32>
      %165 = vector.shape_cast %164 : vector<1x36x4xf32> to vector<36x4xf32>
      %cst_72 = arith.constant dense<0.000000e+00> : vector<36x256xf32>
      %166 = tpu.matmul %165, %163, %cst_72 {dimension_numbers = #tpu.dot_dimension_numbers<[1], [0], [0], [1], [0, 0, 1, 1], [], []>} : vector<36x4xf32>, vector<4x256xf32>, vector<36x256xf32> -> vector<36x256xf32>
      %167 = vector.extract_strided_slice %166 {offsets = [0, 0], sizes = [4, 256], strides = [1, 1]} : vector<36x256xf32> to vector<4x256xf32>
      %c34_i32_73 = arith.constant 34 : i32
      %168 = tpu.dynamic_rotate %167 by %c34_i32_73 dim 1 : vector<4x256xf32>, i32 -> vector<4x256xf32>
      %169 = vector.extract_strided_slice %41 {offsets = [0, 0], sizes = [1, 256], strides = [1, 1]} : vector<9x256xf32> to vector<1x256xf32>
      %170 = vector.broadcast %169 : vector<1x256xf32> to vector<4x256xf32>
      %171 = arith.mulf %168, %170 : vector<4x256xf32>
      %172 = vector.extract_strided_slice %166 {offsets = [4, 0], sizes = [4, 256], strides = [1, 1]} : vector<36x256xf32> to vector<4x256xf32>
      %c32_i32_74 = arith.constant 32 : i32
      %173 = tpu.dynamic_rotate %172 by %c32_i32_74 dim 1 : vector<4x256xf32>, i32 -> vector<4x256xf32>
      %174 = vector.extract_strided_slice %41 {offsets = [1, 0], sizes = [1, 256], strides = [1, 1]} : vector<9x256xf32> to vector<1x256xf32>
      %175 = vector.broadcast %174 : vector<1x256xf32> to vector<4x256xf32>
      %176 = arith.mulf %173, %175 : vector<4x256xf32>
      %177 = arith.addf %171, %176 : vector<4x256xf32>
      %178 = vector.extract_strided_slice %166 {offsets = [8, 0], sizes = [4, 256], strides = [1, 1]} : vector<36x256xf32> to vector<4x256xf32>
      %c30_i32_75 = arith.constant 30 : i32
      %179 = tpu.dynamic_rotate %178 by %c30_i32_75 dim 1 : vector<4x256xf32>, i32 -> vector<4x256xf32>
      %180 = vector.extract_strided_slice %41 {offsets = [2, 0], sizes = [1, 256], strides = [1, 1]} : vector<9x256xf32> to vector<1x256xf32>
      %181 = vector.broadcast %180 : vector<1x256xf32> to vector<4x256xf32>
      %182 = arith.mulf %179, %181 : vector<4x256xf32>
      %183 = arith.addf %177, %182 : vector<4x256xf32>
      %184 = vector.extract_strided_slice %166 {offsets = [12, 0], sizes = [4, 256], strides = [1, 1]} : vector<36x256xf32> to vector<4x256xf32>
      %c2_i32_76 = arith.constant 2 : i32
      %185 = tpu.dynamic_rotate %184 by %c2_i32_76 dim 1 : vector<4x256xf32>, i32 -> vector<4x256xf32>
      %186 = vector.extract_strided_slice %41 {offsets = [3, 0], sizes = [1, 256], strides = [1, 1]} : vector<9x256xf32> to vector<1x256xf32>
      %187 = vector.broadcast %186 : vector<1x256xf32> to vector<4x256xf32>
      %188 = arith.mulf %185, %187 : vector<4x256xf32>
      %189 = arith.addf %183, %188 : vector<4x256xf32>
      %190 = vector.extract_strided_slice %166 {offsets = [16, 0], sizes = [4, 256], strides = [1, 1]} : vector<36x256xf32> to vector<4x256xf32>
      %191 = arith.addf %189, %190 : vector<4x256xf32>
      %192 = vector.extract_strided_slice %166 {offsets = [20, 0], sizes = [4, 256], strides = [1, 1]} : vector<36x256xf32> to vector<4x256xf32>
      %c254_i32_77 = arith.constant 254 : i32
      %193 = tpu.dynamic_rotate %192 by %c254_i32_77 dim 1 : vector<4x256xf32>, i32 -> vector<4x256xf32>
      %194 = vector.extract_strided_slice %41 {offsets = [5, 0], sizes = [1, 256], strides = [1, 1]} : vector<9x256xf32> to vector<1x256xf32>
      %195 = vector.broadcast %194 : vector<1x256xf32> to vector<4x256xf32>
      %196 = arith.mulf %193, %195 : vector<4x256xf32>
      %197 = arith.addf %191, %196 : vector<4x256xf32>
      %198 = vector.extract_strided_slice %166 {offsets = [24, 0], sizes = [4, 256], strides = [1, 1]} : vector<36x256xf32> to vector<4x256xf32>
      %c226_i32_78 = arith.constant 226 : i32
      %199 = tpu.dynamic_rotate %198 by %c226_i32_78 dim 1 : vector<4x256xf32>, i32 -> vector<4x256xf32>
      %200 = vector.extract_strided_slice %41 {offsets = [6, 0], sizes = [1, 256], strides = [1, 1]} : vector<9x256xf32> to vector<1x256xf32>
      %201 = vector.broadcast %200 : vector<1x256xf32> to vector<4x256xf32>
      %202 = arith.mulf %199, %201 : vector<4x256xf32>
      %203 = arith.addf %197, %202 : vector<4x256xf32>
      %204 = vector.extract_strided_slice %166 {offsets = [28, 0], sizes = [4, 256], strides = [1, 1]} : vector<36x256xf32> to vector<4x256xf32>
      %c224_i32_79 = arith.constant 224 : i32
      %205 = tpu.dynamic_rotate %204 by %c224_i32_79 dim 1 : vector<4x256xf32>, i32 -> vector<4x256xf32>
      %206 = vector.extract_strided_slice %41 {offsets = [7, 0], sizes = [1, 256], strides = [1, 1]} : vector<9x256xf32> to vector<1x256xf32>
      %207 = vector.broadcast %206 : vector<1x256xf32> to vector<4x256xf32>
      %208 = arith.mulf %205, %207 : vector<4x256xf32>
      %209 = arith.addf %203, %208 : vector<4x256xf32>
      %210 = vector.extract_strided_slice %166 {offsets = [32, 0], sizes = [4, 256], strides = [1, 1]} : vector<36x256xf32> to vector<4x256xf32>
      %c222_i32_80 = arith.constant 222 : i32
      %211 = tpu.dynamic_rotate %210 by %c222_i32_80 dim 1 : vector<4x256xf32>, i32 -> vector<4x256xf32>
      %212 = vector.extract_strided_slice %41 {offsets = [8, 0], sizes = [1, 256], strides = [1, 1]} : vector<9x256xf32> to vector<1x256xf32>
      %213 = vector.broadcast %212 : vector<1x256xf32> to vector<4x256xf32>
      %214 = arith.mulf %211, %213 : vector<4x256xf32>
      %215 = arith.addf %209, %214 : vector<4x256xf32>
      %c2_81 = arith.constant 2 : index
      %c0_82 = arith.constant 0 : index
      %c0_83 = arith.constant 0 : index
      %216 = vector.load %arg7[%c2_81, %c0_82, %c0_83] : memref<3x4x1xf32, #tpu.memory_space<vmem>>, vector<1x4x1xf32>
      %217 = vector.shape_cast %216 : vector<1x4x1xf32> to vector<4x1xf32>
      %218 = vector.broadcast %217 : vector<4x1xf32> to vector<4x256xf32>
      %219 = arith.addf %215, %218 : vector<4x256xf32>
      %cst_84 = arith.constant 0.000000e+00 : f32
      %220 = vector.broadcast %cst_84 : f32 to vector<4x256xf32>
      %221 = arith.maximumf %219, %220 : vector<4x256xf32>
      %c0_85 = arith.constant 0 : index
      %c0_86 = arith.constant 0 : index
      %222 = vector.load %arg8[%c0_85, %c0_86] : memref<1x4xf32, #tpu.memory_space<vmem>>, vector<1x4xf32>
      %cst_87 = arith.constant dense<0.000000e+00> : vector<1x256xf32>
      %223 = tpu.matmul %222, %221, %cst_87 {dimension_numbers = #tpu.dot_dimension_numbers<[1], [0], [0], [1], [0, 0, 1, 1], [], []>} : vector<1x4xf32>, vector<4x256xf32>, vector<1x256xf32> -> vector<1x256xf32>
      %c0_88 = arith.constant 0 : index
      %c0_89 = arith.constant 0 : index
      %224 = vector.load %arg9[%c0_88, %c0_89] : memref<1x1xf32, #tpu.memory_space<vmem>>, vector<1x1xf32>
      %225 = vector.broadcast %224 : vector<1x1xf32> to vector<1x256xf32>
      %226 = arith.addf %223, %225 : vector<1x256xf32>
      %227 = vector.broadcast %226 : vector<1x256xf32> to vector<64x256xf32>
      %228 = vector.broadcast %40 : vector<64x1xf32> to vector<64x256xf32>
      %229 = arith.addf %227, %228 : vector<64x256xf32>
      %cst_90 = arith.constant 0.000000e+00 : f32
      %230 = vector.broadcast %cst_90 : f32 to vector<64x256xf32>
      %231 = arith.subf %230, %229 : vector<64x256xf32>
      %232 = math.exp %231 : vector<64x256xf32>
      %cst_91 = arith.constant 1.000000e+00 : f32
      %233 = vector.broadcast %cst_91 : f32 to vector<64x256xf32>
      %234 = arith.addf %233, %232 : vector<64x256xf32>
      %235 = tpu.reciprocal %234 {approx = true} : vector<64x256xf32> -> vector<64x256xf32>
      %cst_92 = arith.constant 1.000000e+00 : f32
      %236 = vector.broadcast %cst_92 : f32 to vector<64x256xf32>
      %237 = arith.addf %236, %235 : vector<64x256xf32>
      %238 = arith.mulf %237, %1 : vector<64x256xf32>
      %c0_93 = arith.constant 0 : index
      %c0_94 = arith.constant 0 : index
      %c0_95 = arith.constant 0 : index
      %239 = vector.load %arg18[%c0_93, %c0_94, %c0_95] : memref<1x64x256xf32, #tpu.memory_space<vmem>>, vector<1x64x256xf32>
      %240 = vector.shape_cast %239 : vector<1x64x256xf32> to vector<64x256xf32>
      %241 = vector.shape_cast %238 : vector<64x256xf32> to vector<1x64x256xf32>
      tpu.vector_store %arg18[%c0_93, %c0_94, %c0_95], %241 {strides = array<i32>} : memref<1x64x256xf32, #tpu.memory_space<vmem>>, vector<1x64x256xf32>,
    } else {
    }
    return
  }
  func.func @transform_0(%arg0: i32, %arg1: i32) -> (i32, i32, i32) {
    %c0_i32 = arith.constant 0 : i32
    %c0_i32_0 = arith.constant 0 : i32
    return %arg0, %arg1, %c0_i32 : i32, i32, i32
  }
  func.func @transform_1(%arg0: i32, %arg1: i32) -> (i32, i32) {
    %c0_i32 = arith.constant 0 : i32
    %c0_i32_0 = arith.constant 0 : i32
    %c0_i32_1 = arith.constant 0 : i32
    return %c0_i32, %c0_i32_0 : i32, i32
  }
  func.func @transform_2(%arg0: i32, %arg1: i32) -> (i32, i32) {
    %c0_i32 = arith.constant 0 : i32
    %c0_i32_0 = arith.constant 0 : i32
    return %c0_i32, %arg1 : i32, i32
  }
  func.func @transform_3(%arg0: i32, %arg1: i32) -> (i32, i32) {
    %c0_i32 = arith.constant 0 : i32
    %c0_i32_0 = arith.constant 0 : i32
    %c0_i32_1 = arith.constant 0 : i32
    return %c0_i32, %c0_i32_0 : i32, i32
  }
  func.func @transform_4(%arg0: i32, %arg1: i32) -> (i32, i32, i32) {
    %c0_i32 = arith.constant 0 : i32
    %c0_i32_0 = arith.constant 0 : i32
    %c0_i32_1 = arith.constant 0 : i32
    %c0_i32_2 = arith.constant 0 : i32
    return %c0_i32, %c0_i32_0, %c0_i32_1 : i32, i32, i32
  }
  func.func @transform_5(%arg0: i32, %arg1: i32) -> (i32, i32, i32) {
    %c0_i32 = arith.constant 0 : i32
    %c0_i32_0 = arith.constant 0 : i32
    %c0_i32_1 = arith.constant 0 : i32
    %c0_i32_2 = arith.constant 0 : i32
    return %c0_i32, %c0_i32_0, %c0_i32_1 : i32, i32, i32
  }
  func.func @transform_6(%arg0: i32, %arg1: i32) -> (i32, i32) {
    %c0_i32 = arith.constant 0 : i32
    %c0_i32_0 = arith.constant 0 : i32
    %c0_i32_1 = arith.constant 0 : i32
    return %c0_i32, %c0_i32_0 : i32, i32
  }
  func.func @transform_7(%arg0: i32, %arg1: i32) -> (i32, i32) {
    %c0_i32 = arith.constant 0 : i32
    %c0_i32_0 = arith.constant 0 : i32
    %c0_i32_1 = arith.constant 0 : i32
    return %c0_i32, %c0_i32_0 : i32, i32
  }
  func.func @transform_8(%arg0: i32, %arg1: i32) -> (i32, i32) {
    %c0_i32 = arith.constant 0 : i32
    %c0_i32_0 = arith.constant 0 : i32
    %c0_i32_1 = arith.constant 0 : i32
    return %c0_i32, %c0_i32_0 : i32, i32
  }
  func.func @transform_9(%arg0: i32, %arg1: i32) -> (i32, i32) {
    %c0_i32 = arith.constant 0 : i32
    %c0_i32_0 = arith.constant 0 : i32
    %c0_i32_1 = arith.constant 0 : i32
    return %c0_i32, %c0_i32_0 : i32, i32
  }
  func.func @transform_10(%arg0: i32, %arg1: i32) -> (i32, i32) {
    %c0_i32 = arith.constant 0 : i32
    %c0_i32_0 = arith.constant 0 : i32
    %c0_i32_1 = arith.constant 0 : i32
    return %c0_i32, %c0_i32_0 : i32, i32
  }
  func.func @transform_11(%arg0: i32, %arg1: i32) -> (i32, i32) {
    %c0_i32 = arith.constant 0 : i32
    %c0_i32_0 = arith.constant 0 : i32
    %c0_i32_1 = arith.constant 0 : i32
    return %c0_i32, %c0_i32_0 : i32, i32
  }
  func.func @transform_12(%arg0: i32, %arg1: i32) -> (i32, i32) {
    %c0_i32 = arith.constant 0 : i32
    %c0_i32_0 = arith.constant 0 : i32
    %c0_i32_1 = arith.constant 0 : i32
    return %c0_i32, %c0_i32_0 : i32, i32
  }
  func.func @transform_13(%arg0: i32, %arg1: i32) -> (i32, i32) {
    %c0_i32 = arith.constant 0 : i32
    %c0_i32_0 = arith.constant 0 : i32
    %c0_i32_1 = arith.constant 0 : i32
    return %c0_i32, %c0_i32_0 : i32, i32
  }
  func.func @transform_14(%arg0: i32, %arg1: i32) -> (i32, i32) {
    %c0_i32 = arith.constant 0 : i32
    %c0_i32_0 = arith.constant 0 : i32
    %c0_i32_1 = arith.constant 0 : i32
    return %c0_i32, %c0_i32_0 : i32, i32
  }
  func.func @transform_15(%arg0: i32, %arg1: i32) -> (i32, i32) {
    %c0_i32 = arith.constant 0 : i32
    %c0_i32_0 = arith.constant 0 : i32
    %c0_i32_1 = arith.constant 0 : i32
    return %c0_i32, %c0_i32_0 : i32, i32
  }
  func.func @transform_16(%arg0: i32, %arg1: i32) -> (i32, i32, i32) {
    %c0_i32 = arith.constant 0 : i32
    %c0_i32_0 = arith.constant 0 : i32
    %c0_i32_1 = arith.constant 0 : i32
    return %arg0, %c0_i32, %c0_i32_0 : i32, i32, i32
  }
}

</mosaic_0001>

<bundles_post_ra>
// kernel: tpu_custom_call.1
= control target key start
LH: loop header
LB: loop body
LE: loop exit
PB: predicated region body
PF: predicated region fallthrough
CT: control target
= control target key end

     0   :  { %s3610_s0 = inlined_call_operand.vmem [shape: f32[2,64,256], index: 0, kind: input, shape index: {}]   ;;  %s3611_s1 = inlined_call_operand.vmem [shape: f32[9,256], index: 1, kind: input, shape index: {}]   ;;  %s3612_s2 = inlined_call_operand.hbm [shape: f32[4,64], index: 2, kind: input, shape index: {}]   ;;  %s3613_s3 = inlined_call_operand.vmem [shape: f32[4,1], index: 3, kind: input, shape index: {}]   ;;  %s3614_s4 = inlined_call_operand.vmem [shape: f32[3,36,4], index: 4, kind: input, shape index: {}]   ;;  %s3615_s5 = inlined_call_operand.vmem [shape: f32[3,4,1], index: 5, kind: input, shape index: {}]   ;;  %s3616_s6 = inlined_call_operand.hbm [shape: f32[1,4], index: 6, kind: input, shape index: {}]   ;;  %s3617_s7 = inlined_call_operand.<no memory space> [shape: f32[1,1], index: 7, kind: input, shape index: {}]   ;;  %s3618_s8 = inlined_call_operand.vmem [shape: f32[4,64], index: 8, kind: input, shape index: {}]   ;;  %s3619_s9 = inlined_call_operand.vmem [shape: f32[4,1], index: 9, kind: input, shape index: {}]   ;;  %s3620_s10 = inlined_call_operand.vmem [shape: f32[4,4], index: 10, kind: input, shape index: {}]   ;;  %s3621_s11 = inlined_call_operand.vmem [shape: f32[4,1], index: 11, kind: input, shape index: {}]   ;;  %s3622_s12 = inlined_call_operand.vmem [shape: f32[4,4], index: 12, kind: input, shape index: {}]   ;;  %s3623_s13 = inlined_call_operand.vmem [shape: f32[4,1], index: 13, kind: input, shape index: {}]   ;;  %s3624_s14 = inlined_call_operand.vmem [shape: f32[64,4], index: 14, kind: input, shape index: {}]   ;;  %s3625_s15 = inlined_call_operand.vmem [shape: f32[64,1], index: 15, kind: input, shape index: {}]   ;;  %s3626_s16 = inlined_call_operand.hbm [shape: f32[2,64,256], index: 16, kind: output, shape index: {}]  }
   0x1   :  { %3650 = sst [smem:[#allocation19_spill]] %s3610_s0  ;;  %v21_v0 = vstv %s3617_s7 }
   0x2   :  { %3651 = sst [smem:[#allocation20_spill]] %s3611_s1  ;;  %22 = vst [vmem:[#allocation4] sm:$0x1] %v21_v0 }
   0x3   :  { %3652 = sst [smem:[#allocation21_spill]] %s3612_s2 }
   0x4   :  { %23 = vsyncpa [#allocation6], 0 }
   0x5   :  { %24 = vsyncpa [#allocation9], 0 }
   0x6   :  { %25 = vsyncpa [#allocation7], 0 }
   0x7   :  { %27 = vsyncpa [#allocation7 + $0x1], 0  ;;  %s2882_s23 = smov 0   ;;  %s2884_s24 = smov 0  }
   0x8   :  { %s2886_s25 = smov 0   ;;  %s2888_s26 = smov 0  }
   0x9   :  { %s2890_s27 = smov 0   ;;  %s2892_s28 = smov 0  }
   0xa LB: > { %3653 = sst [smem:[#allocation14_spill]] %s2763_s25  ;;  %s2330_s7 = sadd.s32 4294967295, %s2775_s28   ;;  %s2775_s28 = sphi %s2892_s28, %s33_s28   ;;  %s2771_s27 = sphi %s2890_s27, %s3681_s27   ;;  %s2767_s26 = sphi %s2888_s26, %s3680_s26   ;;  %s2763_s25 = sphi %s2886_s25, %s3679_s25   ;;  %s2759_s24 = sphi %s2884_s24, %s3683_s24   ;;  %s2755_s23 = sphi %s2882_s23, %s3682_s23  }
   0xb   : > { %3654 = sst [smem:[#allocation15_spill]] %s2771_s27  ;;  %s2331_s29 = sadd.s32 4294967294, %s2775_s28  }
   0xc   : > { %s45_s30 = sadd.s32 1, %s2771_s27  ;;  %s400_s0 = sadd.s32 1, %s2763_s25 }
   0xd   : > { %p47_p0 = scmp.ge.s32.totalorder %s45_s30, 2  ;;  %p410_p1 = scmp.ne.s32.totalorder %s2763_s25, %s2759_s24 }
   0xe   : > { %p411_p2 = scmp.eq.s32.totalorder %s2330_s7, 1  ;;  %p416_p3 = scmp.ne.s32.totalorder %s2759_s24, %s2755_s23 }
   0xf   : > { %s3685_s30 = smov (%p47_p0, %s45_s30), 0  ;;  %p417_p5 = scmp.eq.s32.totalorder %s2331_s29, 1 }
  0x10   : > { %3655 = sst [smem:[#allocation16_spill]] %s3685_s30  ;;  %p2922_p4 = por %p411_p2, %p410_p1 }
  0x11   : > { %s397_s18 = ssub.s32 %s2771_s27, %s3685_s30  ;;  %p2332_p6 = scmp.ge.s32.totalorder %s2775_s28, 1 }
  0x12   : > { %s3656_s17 = scalar_select %p2922_p4, 1, 0 }
  0x13   : > { %p398_p7 = scmp.eq.s32.totalorder %s397_s18, 0  ;;  %p2929_p8 = por %p417_p5, %p416_p3 }
  0x14   : > { %p424_p9 = scmp.lt.s32.totalorder %s2775_s28, 3  ;;  %p2941_p11 = scmp.eq.s32.totalorder %s2330_s7, 0 }
  0x15   : > { %s3657_s19 = scalar_select %p2929_p8, 1, 0 }
  0x16   : > { %s2935_s20 = scalar_select %p398_p7, %s2763_s25, %s400_s0  }
  0x17   : > { %3658 = sst [smem:[#allocation17_spill]] %s3657_s19  ;;  %p2937_p10 = pnand %p2332_p6, %p424_p9 }
  0x18   : > { %3659 = sst [smem:[#allocation18_spill]] %s2935_s20  ;;  %s2777_s29 = smov [#allocation5]  }
  0x19   : > { %s3661_s22 = scalar_select %p2941_p11, 1, 0 }
  0x1a   : > { %p2477_p12 = pneg %p2937_p10  ;;  %s442_s18 = sshll.u32 %s2777_s29, 4  ;;  %s443_s18 = int_to_ptr.vmem [resolvable:$true] %s442_s18 }
  0x1b   : > { %s2778_s30 = smov [#allocation8]   ;;  %s2650_s7 = scalar_lea.vmem %s443_s18, 64 }
  0x1c   : > { %s462_s27 = sshll.u32 %s2778_s30, 4  ;;  %p2949_p13 = pnand %p2941_p11, %p2477_p12  ;;  %s463_s27 = int_to_ptr.vmem [resolvable:$true] %s462_s27 }
  0x1d   : > { %p2651_p1 = scmp.ne.s32.totalorder %s443_s18, %s2650_s7  ;;  %p2658_p5 = scmp.lt.s32.totalorder %s443_s18, %s443_s18 }
  0x1e   : > { %p2641_p0 = pneg %p2949_p13  ;;  %p2659_p6 = scmp.lt.s32.totalorder %s2650_s7, %s2650_s7 }
  0x20   : > { %p2653_p2 = pnand %p2651_p1, %p2641_p0  ;;  %p2660_p7 = por %p2659_p6, %p2658_p5 }
  0x22   : > { %p2654_p3 = pneg %p2653_p2 }
  0x24   : > { %p2661_p9 = pnand %p2660_p7, %p2654_p3 }
  0x26   : > { %2664 = shalt.err (!%p2661_p9)
}
  0x27   : > { %s3663_s2 = sld [smem:[#allocation21_spill]]  ;;  %s2676_s20 = scalar_lea.vmem %s463_s27, 16 }
  0x28   : > { %p2677_p12 = scmp.ne.s32.totalorder %s463_s27, %s2676_s20  ;;  %s2683_s25 = scalar_lea.vmem %s463_s27, 32 }
  0x29   : > { %p2684_p1 = scmp.lt.s32.totalorder %s463_s27, %s463_s27  ;;  %p2685_p2 = scmp.lt.s32.totalorder %s2683_s25, %s2676_s20 }
  0x2a   : > { %p2679_p8 = pnand %p2677_p12, %p2641_p0 }
  0x2b   : > { %p2686_p11 = por %p2685_p2, %p2684_p1 }
  0x2c   : > { %p2680_p4 = pneg %p2679_p8 }
  0x2d   : > { %2480 = dma.hbm_to_vmem [thread:$0]  (!%p2949_p13), %s3663_s2, 64, %s443_s18, [#allocation6]  }
  0x2e   : > { %p2687_p5 = pnand %p2686_p11, %p2680_p4 }
  0x30   : > { %2690 = shalt.err (!%p2687_p5)
}
  0x31   : > { %2483 = dma.hbm_to_vmem [thread:$0]  (!%p2949_p13), %s3616_s6, 16, %s463_s27, [#allocation9]  }
  0x32   : > { %516 = sbr.rel (%p2937_p10) target bundleno = 1972 (0x7b4), region = 84  ;;  %p3664_p3 = scmp.ne.s32.totalorder (!%p2937_p10), %s3661_s22, 0 }
  0x37   : > { %2742 = dma.done.wait (%p3664_p3), [#allocation6], 64  }
  0x38   : > { %2744 = vsyncadd (%p3664_p3), [#allocation6], 4294967232 }
  0x39   : > { %2746 = dma.done.wait (%p3664_p3), [#allocation9], 16  }
  0x3a   : > { %2748 = vsyncadd (%p3664_p3), [#allocation9], 4294967280  ;;  %p576_p4 = scmp.lt.s32.totalorder %s2767_s26, 1  ;;  %s3665_s21 = sld [smem:[#allocation19_spill]]  ;;  %v2779_v25 = vmov 0.0   ;;  %vm2780_vm0 = vmmov 0   ;;  %v1140_v62 = vlaneseq }
  0x3b   : > { %2424 = vmatprep.subr.mxu1 %v2779_v25  ;;  %677 = vmatprep.mubr.f32.mxu0 %v2779_v25  ;;  %vm609_vm1 = vcmask 523264   ;;  %v608_v26 = vld [vmem:[#allocation5] sm:$0xf]  ;;  %vm723_vm2 = vcmask 7168   ;;  %v2781_v53 = vmov 0   ;;  %vm825_vm3 = vcmask 1043456  }
  0x3c   : > { %s577_s25 = scalar_select %p576_p4, %s2767_s26, 1  ;;  %2440 = vmatprep.mubr.msk.f32.mxu1 %vm2780_vm0, %v2779_v25  ;;  %v743_v51 = vld [vmem:[%s3618_s8] sm:$0xf]  ;;  %2557 = vset.pattern.permute.xlu0 %v2781_v53  ;;  %vm821_vm4 = vcmask 31744   ;;  %v2782_v60 = vmov 839922192  }
  0x3d   : > { %v1132_v52 = vld [vmem:[%s3613_s3] sm:$0xf]  ;;  %2558 = vset.pattern.permute.xlu1 %v2781_v53  ;;  %v1138_v61 = vunpack.c.l.s4 %v2782_v60  ;;  %v3046_v0 = vshrl.u32 %v1140_v62, 7  ;;  %s3636_s7 = smov 34   ;;  %s3638_s19 = smov 98  }
  0x3e   : > { %s2400_s27 = sshll.u32 %s577_s25, 7  ;;  %v744_v54 = vld [vmem:[%s3619_s9] sm:$0xf]  ;;  %s3634_s25 = smov 32  }
  0x3f   : > { %v819_v59 = vld [vmem:[%s3620_s10] sm:$0xf]  ;;  %v1139_v63 = vunpack.c.0.s8 %v1138_v61  ;;  %s3642_s20 = smov 30   ;;  %s3646_s22 = smov 94   ;;  %v1302_v60 = vsub.s32 1, %v3046_v0  ;;  %v3153_v61 = vsub.s32 0, %v3046_v0 }
  0x40   : > { %s2986_s18 = scalar_lea.vmem %s3665_s21, %s2400_s27  ;;  %s3648_s27 = smov 126  }
  0x41   : > { %v600_v1 = vld [vmem:[%s2986_s18 + $0x70] sm:$0xff]  ;;  %v601_v2 = vld [vmem:[%s2986_s18 + $0x78] sm:$0xff]  ;;  %v598_v3 = vld [vmem:[%s2986_s18 + $0x60] sm:$0xff]  ;;  %s3640_s21 = smov 96   ;;  %s3668_s1 = sld [smem:[#allocation20_spill]] }
  0x42   : > { %v711_v4 = vadd.f32 %v601_v2, %v600_v1  ;;  %v599_v5 = vld [vmem:[%s2986_s18 + $0x68] sm:$0xff]  ;;  %v596_v6 = vld [vmem:[%s2986_s18 + $0x50] sm:$0xff]  ;;  %v597_v7 = vld [vmem:[%s2986_s18 + $0x58] sm:$0xff]  ;;  %629 = vmatprep.subr.mxu0 %v601_v2  ;;  %v1142_v2 = vsub.s32 %v1139_v63, %v3046_v0  ;;  %s3671_s29 = smov 30   ;;  %s3672_s0 = smov 2  }
  0x43   : > { %v705_v8 = vadd.f32 %v597_v7, %v596_v6  ;;  %v594_v9 = vld [vmem:[%s2986_s18 + $0x40] sm:$0xff]  ;;  %v595_v10 = vld [vmem:[%s2986_s18 + $0x48] sm:$0xff]  ;;  %630 = vmatpush1.msra.mxu0 %v600_v1  ;;  %v708_v11 = vadd.f32 %v599_v5, %v598_v3  ;;  %v592_v13 = vld [vmem:[%s2986_s18 + $0x30] sm:$0xff]  ;;  %s3674_s2 = smov 94   ;;  %p3675_p10 = scmp.ne.s32.totalorder %s3656_s17, 0 }
  0x44   : > { %712 = vadd.xlane.f32.xlu0 %v711_v4  ;;  %631 = vmatprep.subr.mxu0 %v599_v5  ;;  %v702_v12 = vadd.f32 %v595_v10, %v594_v9  ;;  %v593_v14 = vld [vmem:[%s2986_s18 + $0x38] sm:$0xff]  ;;  %v590_v15 = vld [vmem:[%s2986_s18 + $0x20] sm:$0xff]  ;;  %v591_v16 = vld [vmem:[%s2986_s18 + $0x28] sm:$0xff] }
  0x45   : > { %706 = vadd.xlane.f32.xlu1 %v705_v8  ;;  %632 = vmatpush1.msra.mxu0 %v598_v3  ;;  %v699_v17 = vadd.f32 %v593_v14, %v592_v13  ;;  %v696_v18 = vadd.f32 %v591_v16, %v590_v15  ;;  %v588_v19 = vld [vmem:[%s2986_s18 + $0x10] sm:$0xff]  ;;  %v589_v20 = vld [vmem:[%s2986_s18 + $0x18] sm:$0xff]  ;;  %v586_v21 = vld [vmem:[%s2986_s18] sm:$0xff] }
  0x46   : > { %633 = vmatprep.subr.mxu0 %v597_v7  ;;  %v587_v22 = vld [vmem:[%s2986_s18 + $0x8] sm:$0xff]  ;;  %v693_v23 = vadd.f32 %v589_v20, %v588_v19 }
  0x47   : > { %634 = vmatpush1.msra.mxu0 %v596_v6  ;;  %v690_v24 = vadd.f32 %v587_v22, %v586_v21  ;;  %v1127_v63 = vld [vmem:[%s3668_s1] sm:$0xff] }
  0x48   : > { %709 = vadd.xlane.f32.xlu0 %v708_v11  ;;  %635 = vmatprep.subr.mxu0 %v595_v10 }
  0x49   : > { %703 = vadd.xlane.f32.xlu1 %v702_v12  ;;  %636 = vmatpush1.msra.mxu0 %v594_v9  ;;  %v820_v9 = vld [vmem:[%s3621_s11] sm:$0xf] }
  0x4a   : > { %637 = vmatprep.subr.mxu0 %v593_v14 }
  0x4b   : > { %638 = vmatpush1.msra.mxu0 %v592_v13 }
  0x4c   : > { %700 = vadd.xlane.f32.xlu0 %v699_v17  ;;  %639 = vmatprep.subr.mxu0 %v591_v16  ;;  %v1147_v16 = vld [vmem:[%s3614_s4] sm:$0xff]  ;;  %v1148_v17 = vld [vmem:[%s3614_s4 + $0x8] sm:$0xff] }
  0x4d   : > { %697 = vadd.xlane.f32.xlu1 %v696_v18  ;;  %640 = vmatpush1.msra.mxu0 %v590_v15  ;;  %v900_v15 = vld [vmem:[%s3622_s12] sm:$0xf]  ;;  %v1149_v18 = vld [vmem:[%s3614_s4 + $0x10] sm:$0xff] }
  0x4e   : > { %641 = vmatprep.subr.mxu0 %v589_v20  ;;  %v1151_v20 = vld [vmem:[%s3614_s4 + $0x20] sm:$0xf] }
  0x4f   : > { %642 = vmatpush1.msra.mxu0 %v588_v19  ;;  %v1150_v19 = vld [vmem:[%s3614_s4 + $0x18] sm:$0xff] }
  0x50   : > { %694 = vadd.xlane.f32.xlu0 %v693_v23  ;;  %643 = vmatprep.subr.mxu0 %v587_v22 }
  0x51   : > { %691 = vadd.xlane.f32.xlu1 %v690_v24  ;;  %644 = vmatpush1.msra.mxu0 %v586_v21  ;;  %v901_v21 = vld [vmem:[%s3623_s13] sm:$0xf] }
  0x52   : > { %2443 = vmatprep.subr.mxu0 %v2779_v25  ;;  %2342 = vmatmul.mubr.msk.f32.vlgmr.msra.gmra.mxu0 %vm609_vm1, %v608_v26 }
  0x53   : > { %2445 = vmatprep.mubr.msk.f32.mxu0 %vm2780_vm0, %v2779_v25 }
  0x66   : > { %1135 = vperm.xlu0 %2557, %v1132_v52  }
  0xcd   : > { %v713_v27 = vpop.xlane.xlu0 %712 }
  0xce   : > { %v722_v28 = vmul.f32 0.00390625, %v713_v27  ;;  %v707_v29 = vpop.xlane.xlu1 %706 }
  0xcf   : > { %v720_v30 = vmul.f32 0.00390625, %v707_v29 }
  0xd0   : > { %731 = vst.msk [vmem:[#allocation3 + $0x38] sm:$0xff] %vm723_vm2, %v722_v28 }
  0xd1   : > { %v710_v31 = vpop.xlane.xlu0 %709  ;;  %729 = vst.msk [vmem:[#allocation3 + $0x28] sm:$0xff] %vm723_vm2, %v720_v30 }
  0xd2   : > { %v721_v32 = vmul.f32 0.00390625, %v710_v31  ;;  %v704_v33 = vpop.xlane.xlu1 %703 }
  0xd3   : > { %v719_v34 = vmul.f32 0.00390625, %v704_v33 }
  0xd4   : > { %730 = vst.msk [vmem:[#allocation3 + $0x30] sm:$0xff] %vm723_vm2, %v721_v32 }
  0xd5   : > { %728 = vst.msk [vmem:[#allocation3 + $0x20] sm:$0xff] %vm723_vm2, %v719_v34  ;;  %v701_v35 = vpop.xlane.xlu0 %700 }
  0xd6   : > { %v718_v36 = vmul.f32 0.00390625, %v701_v35  ;;  %v698_v37 = vpop.xlane.xlu1 %697 }
  0xd7   : > { %v742_v38 = vld [vmem:[#allocation3 + $0x38] sm:$0xff]  ;;  %v717_v39 = vmul.f32 0.00390625, %v698_v37 }
  0xd8   : > { %727 = vst.msk [vmem:[#allocation3 + $0x18] sm:$0xff] %vm723_vm2, %v718_v36  ;;  %2425 = vmatpush3.msra.mxu1 %v742_v38  ;;  %v740_v45 = vld [vmem:[#allocation3 + $0x28] sm:$0xff] }
  0xd9   : > { %726 = vst.msk [vmem:[#allocation3 + $0x10] sm:$0xff] %vm723_vm2, %v717_v39  ;;  %2426 = vmatprep.subr.mxu1 %v2779_v25  ;;  %v695_v40 = vpop.xlane.xlu0 %694 }
  0xda   : > { %v716_v41 = vmul.f32 0.00390625, %v695_v40  ;;  %v692_v42 = vpop.xlane.xlu1 %691 }
  0xdb   : > { %v741_v43 = vld [vmem:[#allocation3 + $0x30] sm:$0xff]  ;;  %v715_v44 = vmul.f32 0.00390625, %v692_v42  ;;  %v1446_v42 = vld [vmem:[%s3615_s5] sm:$0xf] }
  0xdc   : > { %725 = vst.msk [vmem:[#allocation3 + $0x8] sm:$0xff] %vm723_vm2, %v716_v41  ;;  %2427 = vmatpush3.msra.mxu1 %v741_v43  ;;  %v739_v46 = vld [vmem:[#allocation3 + $0x20] sm:$0xff]  ;;  %v980_v43 = vld [vmem:[%s3624_s14 + $0x8] sm:$0xff] }
  0xdd   : > { %2428 = vmatprep.subr.mxu1 %v2779_v25  ;;  %724 = vst.msk [vmem:[#allocation3] sm:$0xff] %vm723_vm2, %v715_v44  ;;  %v979_v41 = vld [vmem:[%s3624_s14] sm:$0xff] }
  0xde   : > { %2429 = vmatpush3.msra.mxu1 %v740_v45  ;;  %v981_v45 = vld [vmem:[%s3624_s14 + $0x10] sm:$0xff] }
  0xdf   : > { %2430 = vmatprep.subr.mxu1 %v2779_v25  ;;  %v738_v47 = vld [vmem:[#allocation3 + $0x18] sm:$0xff] }
  0xe0   : > { %2431 = vmatpush3.msra.mxu1 %v739_v46  ;;  %v737_v48 = vld [vmem:[#allocation3 + $0x10] sm:$0xff]  ;;  %v982_v46 = vld [vmem:[%s3624_s14 + $0x18] sm:$0xff] }
  0xe1   : > { %2432 = vmatprep.subr.mxu1 %v2779_v25  ;;  %v1136_v3 = vpop.permute.xlu0 %1135 }
  0xe2   : > { %2433 = vmatpush3.msra.mxu1 %v738_v47  ;;  %v1143_v5 = vrot.slane %v1136_v3, %v1142_v2  ;;  %v1128_v3 = vld [vmem:[%s3668_s1 + $0x8] sm:$0xff] }
  0xe3   : > { %2434 = vmatprep.subr.mxu1 %v2779_v25  ;;  %v736_v49 = vld [vmem:[#allocation3 + $0x8] sm:$0xff] }
  0xe4   : > { %2435 = vmatpush3.msra.mxu1 %v737_v48  ;;  %v735_v50 = vld [vmem:[#allocation3] sm:$0xff] }
  0xe5   : > { %2436 = vmatprep.subr.mxu1 %v2779_v25  ;;  %v983_v48 = vld [vmem:[%s3624_s14 + $0x20] sm:$0xff] }
  0xe6   : > { %2437 = vmatpush3.msra.mxu1 %v736_v49  ;;  %v984_v49 = vld [vmem:[%s3624_s14 + $0x28] sm:$0xff] }
  0xe7   : > { %2438 = vmatprep.subr.mxu1 %v2779_v25 }
  0xe8   : > { %2439 = vmatpush3.msra.mxu1 %v735_v50  ;;  %v985_v50 = vld [vmem:[%s3624_s14 + $0x30] sm:$0xff] }
  0xe9   : > { %2441 = vmatmul.mubr.msk.f32.vlgmr.msra.gmra.mxu1 %vm609_vm1, %v743_v51  ;;  %2448 = vmatprep.subr.mxu1 %v2779_v25  ;;  %v986_v51 = vld [vmem:[%s3624_s14 + $0x38] sm:$0xff] }
  0xea   : > { %2450 = vmatprep.mubr.msk.f32.mxu1 %vm2780_vm0, %v2779_v25 }
 0x112   : > { %v679_v1 = vpop.f32.mrf.mxu0 }
 0x114   : > { %v681_v4 = vpop.f32.mrf.mxu0 }
 0x115   : > { %v686_v6 = vcombine.low %v679_v1, %v681_v4  ;;  %v1321_v1 = vsub.s32 2, %v3046_v0  ;;  %v3166_v4 = vrot.slane %v1128_v3, %v1302_v60 }
 0x117   : > { %v1145_v7 = vadd.f32 %v1143_v5, %v686_v6  ;;  %v1346_v5 = vsub.s32 3, %v3046_v0  ;;  %v3171_v6 = vrot.slane %v1127_v63, %v3153_v61 }
 0x119   : > { %v1146_v8 = vmax.f32 %v1145_v7, 0.0 }
 0x11b   : > { %v1153_v12 = vcombine.high %v1146_v8, %v1146_v8 }
 0x1a9   : > { %v814_v55 = vpop.f32.mrf.mxu1 }
 0x1aa   : > { %v815_v56 = vadd.f32 %v814_v55, %v744_v54 }
 0x1ab   : > { %v2442_v57 = vpop.f32.mrf.mxu1 }
 0x1ac   : > { %v818_v58 = vmax.f32 %v815_v56, 0.0 }
 0x1ae   : > { %2444 = vmatpush3.msk.msra.mxu0 %vm825_vm3, %v818_v58 }
 0x1af   : > { %2446 = vmatmul.mubr.msk.f32.vlgmr.msra.gmra.mxu0 %vm821_vm4, %v819_v59  ;;  %v3149_v59 = vand.u32 127, %v1140_v62  ;;  %v3164_v62 = vrot.slane %v1127_v63, %v1302_v60 }
 0x1b0   : > { %2455 = vmatprep.mubr.msk.f32.mxu0 %vm821_vm4, %v979_v41  ;;  %v1392_v41 = vsub.s32 6, %v3046_v0 }
 0x1b1   : > { %vm1297_vm5 = vcmp.lt.s32.totalorder %v3149_v59, 32  ;;  %vm1274_vm6 = vcmp.lt.s32.totalorder %v3149_v59, 34  ;;  %vm1316_vm7 = vcmp.lt.s32.totalorder %v3149_v59, 30  ;;  %vm1341_vm8 = vcmp.lt.s32.totalorder %v3149_v59, 2 }
 0x1b2   : > { %vm1368_vm9 = vcmp.lt.s32.totalorder %v3149_v59, 126  ;;  %vm1387_vm10 = vcmp.lt.s32.totalorder %v3149_v59, 98  ;;  %vm1412_vm11 = vcmp.lt.s32.totalorder %v3149_v59, 96  ;;  %vm1431_vm12 = vcmp.lt.s32.totalorder %v3149_v59, 94 }
 0x26f   : > { %v895_v10 = vpop.f32.mrf.mxu0 }
 0x270   : > { %v896_v11 = vadd.f32 %v895_v10, %v820_v9  ;;  %v3178_v9 = vrot.slane %v1128_v3, %v3153_v61  ;;  %v3180_v10 = vrot.slane %v1127_v63, %v1321_v1 }
 0x271   : > { %v2447_v13 = vpop.f32.mrf.mxu0 }
 0x272   : > { %v899_v14 = vmax.f32 %v896_v11, 0.0  ;;  %v3182_v11 = vrot.slane %v1128_v3, %v1321_v1 }
 0x274   : > { %2449 = vmatpush3.msk.msra.mxu1 %vm825_vm3, %v899_v14 }
 0x275   : > { %2451 = vmatmul.mubr.msk.f32.vlgmr.msra.gmra.mxu1 %vm821_vm4, %v900_v15  ;;  %2357 = vmatprep.subr.msk.mxu1 %vm825_vm3, %v1153_v12 }
 0x276   : > { %2358 = vmatpush1.msk.msra.mxu1 %vm825_vm3, %v1146_v8  ;;  %1237 = vmatprep.mubr.f32.mxu1 %v2779_v25 }
 0x279   : > { %2359 = vmatmul.mubr.msk.f32.vlgmr.msra.gmra.mxu1 %vm821_vm4, %v1147_v16 }
 0x27a   : > { %1243 = vmatprep.mubr.f32.mxu1 %v2779_v25 }
 0x27d   : > { %2360 = vmatmul.mubr.msk.f32.gmra.mxu1 %vm821_vm4, %v1148_v17 }
 0x27e   : > { %1249 = vmatprep.mubr.f32.mxu1 %v2779_v25 }
 0x281   : > { %2361 = vmatmul.mubr.msk.f32.gmra.mxu1 %vm821_vm4, %v1149_v18 }
 0x282   : > { %1255 = vmatprep.mubr.f32.mxu1 %v2779_v25 }
 0x285   : > { %2362 = vmatmul.mubr.msk.f32.gmra.mxu1 %vm821_vm4, %v1150_v19 }
 0x286   : > { %1261 = vmatprep.mubr.f32.mxu1 %v2779_v25 }
 0x289   : > { %2363 = vmatmul.mubr.msk.f32.gmra.mxu1 %vm821_vm4, %v1151_v20  ;;  %v3195_v20 = vrot.slane %v1127_v63, %v1346_v5 }
 0x28a   : > { %1784 = vmatprep.mubr.f32.mxu1 %v2779_v25 }
 0x335   : > { %v974_v22 = vpop.f32.mrf.mxu1 }
 0x336   : > { %v975_v23 = vadd.f32 %v974_v22, %v901_v21  ;;  %v3197_v21 = vrot.slane %v1128_v3, %v1346_v5 }
 0x337   : > { %v2452_v24 = vpop.f32.mrf.mxu1 }
 0x338   : > { %v978_v26 = vmax.f32 %v975_v23, 0.0 }
 0x339   : > { %v1239_v27 = vpop.f32.mrf.mxu1 }
 0x33a   : > { %2453 = vmatprep.subr.msk.mxu0 %vm825_vm3, %v978_v26  ;;  %1268 = vrot.lane.b32.xlu1 %v1239_v27, %s3636_s7  ;;  %v1289_v31 = vrot.slane %v1239_v27, 4 }
 0x33b   : > { %2454 = vmatpush3.msk.msra.mxu0 %vm825_vm3, %v978_v26  ;;  %v1241_v28 = vpop.f32.mrf.mxu1 }
 0x33c   : > { %v1290_v35 = vrot.slane %v1241_v28, 4  ;;  %2456 = vmatmul.mubr.msk.f32.vlgmr.msra.gmra.mxu0 %vm821_vm4, %v980_v43  ;;  %v1417_v43 = vsub.s32 7, %v3046_v0 }
 0x33d   : > { %v1245_v29 = vpop.f32.mrf.mxu1  ;;  %2458 = vmatprep.mubr.msk.f32.mxu0 %vm821_vm4, %v981_v45 }
 0x33e   : > { %1270 = vrot.lane.b32.xlu1 %v1241_v28, %s3636_s7  ;;  %v1333_v40 = vrot.slane %v1245_v29, 4  ;;  %s3666_s7 = smov 98  }
 0x33f   : > { %v1247_v30 = vpop.f32.mrf.mxu1 }
 0x340   : > { %v1334_v44 = vrot.slane %v1247_v30, 4  ;;  %2459 = vmatmul.mubr.msk.f32.gmra.mxu0 %vm821_vm4, %v982_v46 }
 0x341   : > { %v3092_v32 = vpop.f32.mrf.mxu1  ;;  %2461 = vmatprep.mubr.msk.f32.mxu0 %vm821_vm4, %v983_v48 }
 0x342   : > { %v1360_v33 = vrot.slane %v3092_v32, 4  ;;  %1293 = vrot.lane.b32.xlu1 %v1289_v31, %s3634_s25 }
 0x343   : > { %v3096_v34 = vpop.f32.mrf.mxu1 }
 0x344   : > { %1364 = vrot.lane.b32.xlu0 %v1360_v33, %s3648_s27  ;;  %v1361_v47 = vrot.slane %v3096_v34, 4  ;;  %2462 = vmatmul.mubr.msk.f32.gmra.mxu0 %vm821_vm4, %v984_v49  ;;  %v3222_v49 = vrot.slane %v1127_v63, %v1392_v41 }
 0x345   : > { %v1257_v36 = vpop.f32.mrf.mxu1  ;;  %2464 = vmatprep.mubr.msk.f32.mxu0 %vm821_vm4, %v985_v50  ;;  %v3224_v50 = vrot.slane %v1128_v3, %v1392_v41 }
 0x346   : > { %1295 = vrot.lane.b32.xlu1 %v1290_v35, %s3634_s25  ;;  %v1404_v37 = vrot.slane %v1257_v36, 4 }
 0x347   : > { %v1259_v38 = vpop.f32.mrf.mxu1 }
 0x348   : > { %1383 = vrot.lane.b32.xlu0 %v1257_v36, %s3638_s19  ;;  %2465 = vmatmul.mubr.msk.f32.gmra.mxu0 %vm821_vm4, %v986_v51  ;;  %v1405_v52 = vrot.slane %v1259_v38, 4  ;;  %s3667_s19 = smov 96  }
 0x349   : > { %v1263_v39 = vpop.f32.mrf.mxu1  ;;  %1547 = vmatprep.mubr.f32.mxu0 %v2779_v25 }
 0x34a   : > { %1312 = vrot.lane.b32.xlu1 %v1245_v29, %s3642_s20 }
 0x34b   : > { %v1265_v53 = vpop.f32.mrf.mxu1 }
 0x34c   : > { %1408 = vrot.lane.b32.xlu0 %v1404_v37, %s3640_s21  ;;  %s3644_s21 = smov 2  }
 0x34e   : > { %1314 = vrot.lane.b32.xlu1 %v1247_v30, %s3642_s20  ;;  %v1373_v30 = vsub.s32 5, %v3046_v0  ;;  %s3670_s20 = smov 32  }
 0x350   : > { %1427 = vrot.lane.b32.xlu0 %v1263_v39, %s3646_s22  ;;  %v3215_v46 = vrot.slane %v1128_v3, %v1373_v30 }
 0x352   : > { %1337 = vrot.lane.b32.xlu1 %v1333_v40, %s3644_s21 }
 0x354   : > { %1449 = vperm.xlu0 %2557, %v1446_v42   ;;  %v3212_v42 = vrot.slane %v1127_v63, %v1373_v30 }
 0x356   : > { %1339 = vrot.lane.b32.xlu1 %v1334_v44, %s3644_s21  ;;  %s3669_s21 = smov 34  }
 0x35a   : > { %1366 = vrot.lane.b32.xlu1 %v1361_v47, %s3648_s27 }
 0x35e   : > { %1385 = vrot.lane.b32.xlu1 %v1259_v38, %s3666_s7 }
 0x362   : > { %1410 = vrot.lane.b32.xlu1 %v1405_v52, %s3667_s19 }
 0x366   : > { %1429 = vrot.lane.b32.xlu1 %v1265_v53, %s3646_s22 }
 0x3ac   : > { %v1269_v54 = vpop.permute.xlu1 %1268 }
 0x3b0   : > { %v1271_v55 = vpop.permute.xlu1 %1270 }
 0x3b1   : > { %v1275_v13 = vsel %vm1274_vm6, %v1269_v54, %v1271_v55  ;;  %v1276_v14 = vsel %vm1274_vm6, %v1271_v55, %v1269_v54  ;;  %v3231_v54 = vrot.slane %v1127_v63, %v1417_v43  ;;  %v3233_v55 = vrot.slane %v1128_v3, %v1417_v43 }
 0x3b2   : > { %v1285_v22 = vmul.f32 %v3171_v6, %v1276_v14  ;;  %v1286_v23 = vmul.f32 %v3178_v9, %v1275_v13  ;;  %v3251_v13 = vld [vmem:[%s3668_s1 + $0x10] ss:$0 sm:$0xff]  ;;  %v3256_v14 = vld [vmem:[%s3668_s1 + $0x18] ss:$0 sm:$0xff]  ;;  %s3673_s1 = smov 126  }
 0x3b4   : > { %v1294_v56 = vpop.permute.xlu1 %1293 }
 0x3b6   : > { %v1365_v15 = vpop.permute.xlu0 %1364 }
 0x3b8   : > { %v1296_v57 = vpop.permute.xlu1 %1295 }
 0x3b9   : > { %v1298_v7 = vsel %vm1297_vm5, %v1294_v56, %v1296_v57  ;;  %v1299_v8 = vsel %vm1297_vm5, %v1296_v57, %v1294_v56 }
 0x3ba   : > { %v1308_v18 = vmul.f32 %v3164_v62, %v1299_v8  ;;  %v1309_v19 = vmul.f32 %v3166_v4, %v1298_v7  ;;  %v1384_v37 = vpop.permute.xlu0 %1383 }
 0x3bc   : > { %v1313_v58 = vpop.permute.xlu1 %1312  ;;  %v1310_v31 = vadd.f32 %v1308_v18, %v1285_v22  ;;  %v1311_v33 = vadd.f32 %v1309_v19, %v1286_v23 }
 0x3be   : > { %v1409_v0 = vpop.permute.xlu0 %1408 }
 0x3c0   : > { %v1315_v2 = vpop.permute.xlu1 %1314 }
 0x3c1   : > { %v1317_v16 = vsel %vm1316_vm7, %v1313_v58, %v1315_v2  ;;  %v1318_v17 = vsel %vm1316_vm7, %v1315_v2, %v1313_v58 }
 0x3c2   : > { %v1327_v24 = vmul.f32 %v3180_v10, %v1318_v17  ;;  %v1328_v26 = vmul.f32 %v3182_v11, %v1317_v16 }
 0x3c4   : > { %v1338_v12 = vpop.permute.xlu1 %1337  ;;  %v1329_v38 = vadd.f32 %v1327_v24, %v1310_v31  ;;  %v1330_v39 = vadd.f32 %v1328_v26, %v1311_v33 }
 0x3c8   : > { %v1340_v27 = vpop.permute.xlu1 %1339 }
 0x3c9   : > { %v1342_v28 = vsel %vm1341_vm8, %v1338_v12, %v1340_v27  ;;  %v1343_v29 = vsel %vm1341_vm8, %v1340_v27, %v1338_v12  ;;  %v1428_v12 = vpop.permute.xlu0 %1427 }
 0x3ca   : > { %v1352_v35 = vmul.f32 %v3195_v20, %v1343_v29  ;;  %v1353_v36 = vmul.f32 %v3197_v21, %v1342_v28 }
 0x3cc   : > { %v1367_v40 = vpop.permute.xlu1 %1366  ;;  %v1354_v44 = vadd.f32 %v1352_v35, %v1329_v38  ;;  %v1355_v45 = vadd.f32 %v1353_v36, %v1330_v39  ;;  %v2366_v36 = vld [vmem:[%s3614_s4 + $0x28] sm:$0xff]  ;;  %v2368_v38 = vld [vmem:[%s3614_s4 + $0x38] sm:$0xff]  ;;  %v2369_v39 = vld [vmem:[%s3614_s4 + $0x40] sm:$0xff] }
 0x3cd   : > { %v1369_v47 = vsel %vm1368_vm9, %v1365_v15, %v1367_v40  ;;  %v1370_v48 = vsel %vm1368_vm9, %v1367_v40, %v1365_v15  ;;  %v2370_v40 = vld [vmem:[%s3614_s4 + $0x48] sm:$0xf] }
 0x3ce   : > { %v1356_v56 = vadd.f32 %v1354_v44, %v3092_v32  ;;  %v1357_v57 = vadd.f32 %v1355_v45, %v3096_v34  ;;  %v1379_v58 = vmul.f32 %v3212_v42, %v1369_v47  ;;  %v1380_v60 = vmul.f32 %v3215_v46, %v1370_v48 }
 0x3cf   : > { %v1450_v29 = vpop.permute.xlu0 %1449 }
 0x3d0   : > { %v1386_v51 = vpop.permute.xlu1 %1385  ;;  %v1381_v32 = vadd.f32 %v1379_v58, %v1356_v56  ;;  %v1382_v3 = vadd.f32 %v1380_v60, %v1357_v57 }
 0x3d1   : > { %v1388_v52 = vsel %vm1387_vm10, %v1384_v37, %v1386_v51  ;;  %v1389_v53 = vsel %vm1387_vm10, %v1386_v51, %v1384_v37  ;;  %v2367_v37 = vld [vmem:[%s3614_s4 + $0x30] sm:$0xff] }
 0x3d2   : > { %v1398_v1 = vmul.f32 %v3222_v49, %v1388_v52  ;;  %v1399_v2 = vmul.f32 %v3224_v50, %v1389_v53 }
 0x3d4   : > { %v1411_v5 = vpop.permute.xlu1 %1410  ;;  %v1400_v15 = vadd.f32 %v1398_v1, %v1381_v32  ;;  %v1401_v16 = vadd.f32 %v1399_v2, %v1382_v3 }
 0x3d5   : > { %v1413_v7 = vsel %vm1412_vm11, %v1409_v0, %v1411_v5  ;;  %v1414_v63 = vsel %vm1412_vm11, %v1411_v5, %v1409_v0 }
 0x3d6   : > { %v1423_v34 = vmul.f32 %v3231_v54, %v1413_v7  ;;  %v1424_v8 = vmul.f32 %v3233_v55, %v1414_v63 }
 0x3d8   : > { %v1430_v17 = vpop.permute.xlu1 %1429  ;;  %v1425_v22 = vadd.f32 %v1423_v34, %v1400_v15  ;;  %v1426_v23 = vadd.f32 %v1424_v8, %v1401_v16 }
 0x3d9   : > { %v1432_v18 = vsel %vm1431_vm12, %v1428_v12, %v1430_v17  ;;  %v1433_v19 = vsel %vm1431_vm12, %v1430_v17, %v1428_v12  ;;  %v2378_v17 = vld [vmem:[%s3615_s5 + $0x4] sm:$0xf] }
 0x3da   : > { %v1442_v24 = vmul.f32 %v3251_v13, %v1432_v18  ;;  %v1443_v26 = vmul.f32 %v3256_v14, %v1433_v19 }
 0x3dc   : > { %v1444_v27 = vadd.f32 %v1442_v24, %v1425_v22  ;;  %v1445_v28 = vadd.f32 %v1443_v26, %v1426_v23 }
 0x3de   : > { %v1452_v30 = vadd.f32 %v1450_v29, %v1444_v27  ;;  %v1453_v31 = vadd.f32 %v1450_v29, %v1445_v28 }
 0x3e0   : > { %v1454_v33 = vmax.f32 %v1452_v30, 0.0  ;;  %v1455_v35 = vmax.f32 %v1453_v31, 0.0 }
 0x3e2   : > { %2371 = vmatprep.subr.msk.mxu0 %vm825_vm3, %v1455_v35 }
 0x3e3   : > { %2372 = vmatpush1.msk.msra.mxu0 %vm825_vm3, %v1454_v33 }
 0x3e4   : > { %2373 = vmatmul.mubr.msk.f32.vlgmr.msra.gmra.mxu0 %vm821_vm4, %v2366_v36 }
 0x3e5   : > { %1553 = vmatprep.mubr.f32.mxu0 %v2779_v25 }
 0x3e8   : > { %2374 = vmatmul.mubr.msk.f32.gmra.mxu0 %vm821_vm4, %v2367_v37 }
 0x3e9   : > { %1559 = vmatprep.mubr.f32.mxu0 %v2779_v25 }
 0x3ec   : > { %2375 = vmatmul.mubr.msk.f32.gmra.mxu0 %vm821_vm4, %v2368_v38 }
 0x3ed   : > { %1565 = vmatprep.mubr.f32.mxu0 %v2779_v25 }
 0x3f0   : > { %2376 = vmatmul.mubr.msk.f32.gmra.mxu0 %vm821_vm4, %v2369_v39 }
 0x3f1   : > { %1571 = vmatprep.mubr.f32.mxu0 %v2779_v25 }
 0x3f4   : > { %2377 = vmatmul.mubr.msk.f32.gmra.mxu0 %vm821_vm4, %v2370_v40 }
 0x3f5   : > { %2014 = vmatprep.mubr.f32.mxu0 %v2779_v25 }
 0x3fc   : > { %v3291_v41 = vpop.f32.mrf.mxu0 }
 0x3fe   : > { %v3293_v43 = vpop.f32.mrf.mxu0 }
 0x400   : > { %v3295_v44 = vpop.f32.mrf.mxu0 }
 0x402   : > { %v3297_v45 = vpop.f32.mrf.mxu0 }
 0x404   : > { %v3299_v47 = vpop.f32.mrf.mxu0 }
 0x406   : > { %v3301_v48 = vpop.f32.mrf.mxu0 }
 0x408   : > { %v3303_v51 = vpop.f32.mrf.mxu0 }
 0x40a   : > { %v3305_v0 = vpop.f32.mrf.mxu0 }
 0x4a4   : > { %v1549_v52 = vpop.f32.mrf.mxu0 }
 0x4a5   : > { %1578 = vrot.lane.b32.xlu1 %v1549_v52, %s3669_s21  ;;  %v1588_v56 = vrot.slane %v1549_v52, 4 }
 0x4a6   : > { %v1551_v53 = vpop.f32.mrf.mxu0 }
 0x4a7   : > { %1580 = vrot.lane.b32.xlu0 %v1551_v53, %s3669_s21  ;;  %v1589_v58 = vrot.slane %v1551_v53, 4 }
 0x4a8   : > { %v1555_v57 = vpop.f32.mrf.mxu0 }
 0x4a9   : > { %1592 = vrot.lane.b32.xlu1 %v1588_v56, %s3670_s20  ;;  %v1614_v2 = vrot.slane %v1555_v57, 4 }
 0x4aa   : > { %v1557_v60 = vpop.f32.mrf.mxu0 }
 0x4ab   : > { %1594 = vrot.lane.b32.xlu0 %v1589_v58, %s3670_s20  ;;  %v1615_v5 = vrot.slane %v1557_v60, 4 }
 0x4ac   : > { %v3312_v1 = vpop.f32.mrf.mxu0 }
 0x4ad   : > { %1602 = vrot.lane.b32.xlu1 %v1555_v57, %s3671_s29  ;;  %v1632_v7 = vrot.slane %v3312_v1, 4 }
 0x4ae   : > { %v1563_v63 = vpop.f32.mrf.mxu0 }
 0x4af   : > { %1604 = vrot.lane.b32.xlu0 %v1557_v60, %s3671_s29  ;;  %v1633_v32 = vrot.slane %v1563_v63, 4 }
 0x4b0   : > { %v1567_v3 = vpop.f32.mrf.mxu0 }
 0x4b1   : > { %1618 = vrot.lane.b32.xlu1 %v1614_v2, %s3672_s0  ;;  %v1658_v8 = vrot.slane %v1567_v3, 4 }
 0x4b2   : > { %v1569_v34 = vpop.f32.mrf.mxu0 }
 0x4b3   : > { %1620 = vrot.lane.b32.xlu0 %v1615_v5, %s3672_s0  ;;  %v1659_v12 = vrot.slane %v1569_v34, 4 }
 0x4b4   : > { %v1573_v15 = vpop.f32.mrf.mxu0 }
 0x4b5   : > { %1636 = vrot.lane.b32.xlu1 %v1632_v7, %s3648_s27 }
 0x4b6   : > { %v1575_v16 = vpop.f32.mrf.mxu0 }
 0x4b7   : > { %1638 = vrot.lane.b32.xlu0 %v1633_v32, %s3648_s27 }
 0x4b9   : > { %1646 = vrot.lane.b32.xlu1 %v1567_v3, %s3666_s7 }
 0x4bb   : > { %1648 = vrot.lane.b32.xlu0 %v1569_v34, %s3666_s7 }
 0x4bd   : > { %1662 = vrot.lane.b32.xlu1 %v1658_v8, %s3667_s19 }
 0x4bf   : > { %1664 = vrot.lane.b32.xlu0 %v1659_v12, %s3667_s19 }
 0x4c1   : > { %1672 = vrot.lane.b32.xlu1 %v1573_v15, %s3646_s22 }
 0x4c3   : > { %1674 = vrot.lane.b32.xlu0 %v1575_v16, %s3646_s22  ;;  %s2401_s22 = sshll.u32 %s2767_s26, 11 }
 0x4c5   : > { %1686 = vperm.xlu1 %2558, %v2378_v17  }
 0x517   : > { %v1579_v18 = vpop.permute.xlu1 %1578 }
 0x519   : > { %v1581_v19 = vpop.permute.xlu0 %1580 }
 0x51a   : > { %v1582_v33 = vsel %vm1274_vm6, %v1579_v18, %v1581_v19  ;;  %v1583_v35 = vsel %vm1274_vm6, %v1581_v19, %v1579_v18 }
 0x51b   : > { %v1593_v22 = vpop.permute.xlu1 %1592  ;;  %v1584_v56 = vmul.f32 %v1583_v35, %v3171_v6  ;;  %v1585_v57 = vmul.f32 %v1582_v33, %v3178_v9 }
 0x51d   : > { %v1595_v23 = vpop.permute.xlu0 %1594 }
 0x51e   : > { %v1596_v29 = vsel %vm1297_vm5, %v1593_v22, %v1595_v23  ;;  %v1597_v30 = vsel %vm1297_vm5, %v1595_v23, %v1593_v22 }
 0x51f   : > { %v1603_v24 = vpop.permute.xlu1 %1602  ;;  %v1598_v38 = vmul.f32 %v1597_v30, %v3164_v62  ;;  %v1599_v39 = vmul.f32 %v1596_v29, %v3166_v4 }
 0x521   : > { %v1605_v26 = vpop.permute.xlu0 %1604  ;;  %v1600_v5 = vadd.f32 %v1598_v38, %v1584_v56  ;;  %v1601_v7 = vadd.f32 %v1599_v39, %v1585_v57 }
 0x522   : > { %v1606_v36 = vsel %vm1316_vm7, %v1603_v24, %v1605_v26  ;;  %v1607_v37 = vsel %vm1316_vm7, %v1605_v26, %v1603_v24 }
 0x523   : > { %v1619_v27 = vpop.permute.xlu1 %1618  ;;  %v1608_v58 = vmul.f32 %v1607_v37, %v3180_v10  ;;  %v1609_v60 = vmul.f32 %v1606_v36, %v3182_v11 }
 0x525   : > { %v1621_v28 = vpop.permute.xlu0 %1620  ;;  %v1610_v8 = vadd.f32 %v1608_v58, %v1600_v5  ;;  %v1611_v12 = vadd.f32 %v1609_v60, %v1601_v7 }
 0x526   : > { %v1622_v52 = vsel %vm1341_vm8, %v1619_v27, %v1621_v28  ;;  %v1623_v53 = vsel %vm1341_vm8, %v1621_v28, %v1619_v27 }
 0x527   : > { %v1637_v31 = vpop.permute.xlu1 %1636  ;;  %v1624_v32 = vmul.f32 %v1623_v53, %v3195_v20  ;;  %v1625_v3 = vmul.f32 %v1622_v52, %v3197_v21 }
 0x529   : > { %v1639_v40 = vpop.permute.xlu0 %1638  ;;  %v1626_v15 = vadd.f32 %v1624_v32, %v1610_v8  ;;  %v1627_v16 = vadd.f32 %v1625_v3, %v1611_v12 }
 0x52a   : > { %v1640_v19 = vsel %vm1368_vm9, %v1637_v31, %v1639_v40  ;;  %v1641_v22 = vsel %vm1368_vm9, %v1639_v40, %v1637_v31 }
 0x52b   : > { %v1647_v2 = vpop.permute.xlu1 %1646  ;;  %v1628_v26 = vadd.f32 %v1626_v15, %v3312_v1  ;;  %v1629_v27 = vadd.f32 %v1627_v16, %v1563_v63  ;;  %v1642_v28 = vmul.f32 %v1640_v19, %v3212_v42  ;;  %v1643_v29 = vmul.f32 %v1641_v22, %v3215_v46  ;;  %v2379_v15 = vld [vmem:[%s3614_s4 + $0x50] sm:$0xff]  ;;  %v2380_v16 = vld [vmem:[%s3614_s4 + $0x58] sm:$0xff] }
 0x52c   : > { %v2383_v19 = vld [vmem:[%s3614_s4 + $0x70] sm:$0xf] }
 0x52d   : > { %v1649_v34 = vpop.permute.xlu0 %1648  ;;  %v1644_v38 = vadd.f32 %v1642_v28, %v1628_v26  ;;  %v1645_v39 = vadd.f32 %v1643_v29, %v1629_v27 }
 0x52e   : > { %v1650_v23 = vsel %vm1387_vm10, %v1647_v2, %v1649_v34  ;;  %v1651_v24 = vsel %vm1387_vm10, %v1649_v34, %v1647_v2 }
 0x52f   : > { %v1663_v17 = vpop.permute.xlu1 %1662  ;;  %v1652_v35 = vmul.f32 %v1650_v23, %v3222_v49  ;;  %v1653_v36 = vmul.f32 %v1651_v24, %v3224_v50 }
 0x531   : > { %v1665_v18 = vpop.permute.xlu0 %1664  ;;  %v1654_v53 = vadd.f32 %v1652_v35, %v1644_v38  ;;  %v1655_v56 = vadd.f32 %v1653_v36, %v1645_v39 }
 0x532   : > { %v1666_v33 = vsel %vm1412_vm11, %v1663_v17, %v1665_v18  ;;  %v1667_v31 = vsel %vm1412_vm11, %v1665_v18, %v1663_v17  ;;  %v2381_v17 = vld [vmem:[%s3614_s4 + $0x60] sm:$0xff]  ;;  %v2382_v18 = vld [vmem:[%s3614_s4 + $0x68] sm:$0xff] }
 0x533   : > { %v1673_v37 = vpop.permute.xlu1 %1672  ;;  %v1668_v40 = vmul.f32 %v1666_v33, %v3231_v54  ;;  %v1669_v52 = vmul.f32 %v1667_v31, %v3233_v55 }
 0x535   : > { %v1675_v30 = vpop.permute.xlu0 %1674  ;;  %v1670_v60 = vadd.f32 %v1668_v40, %v1654_v53  ;;  %v1671_v2 = vadd.f32 %v1669_v52, %v1655_v56  ;;  %v2391_v40 = vld [vmem:[%s3615_s5 + $0x8] sm:$0xf]  ;;  %v987_v52 = vld [vmem:[%s3625_s15] sm:$0xff] }
 0x536   : > { %v1676_v1 = vsel %vm1431_vm12, %v1673_v37, %v1675_v30  ;;  %v1677_v63 = vsel %vm1431_vm12, %v1675_v30, %v1673_v37  ;;  %v1931_v53 = vld [vmem:[#allocation4] sm:$0x1]  ;;  %v988_v56 = vld [vmem:[%s3625_s15 + $0x8] sm:$0xff] }
 0x537   : > { %v1678_v57 = vmul.f32 %v3251_v13, %v1676_v1  ;;  %v1679_v58 = vmul.f32 %v3256_v14, %v1677_v63 }
 0x539   : > { %v1680_v5 = vadd.f32 %v1678_v57, %v1670_v60  ;;  %v1681_v7 = vadd.f32 %v1679_v58, %v1671_v2  ;;  %v1089_v57 = vadd.f32 %v3293_v43, %v987_v52  ;;  %v989_v58 = vld [vmem:[%s3625_s15 + $0x10] sm:$0xff]  ;;  %v1094_v60 = vadd.f32 %v3291_v41, %v988_v56  ;;  %v990_v2 = vld [vmem:[%s3625_s15 + $0x18] sm:$0xff] }
 0x53a   : > { %v1104_v43 = vadd.f32 %v3295_v44, %v990_v2 }
 0x540   : > { %v1687_v32 = vpop.permute.xlu1 %1686 }
 0x541   : > { %v1689_v3 = vadd.f32 %v1687_v32, %v1680_v5  ;;  %v1690_v34 = vadd.f32 %v1687_v32, %v1681_v7  ;;  %v1099_v5 = vadd.f32 %v3297_v45, %v989_v58  ;;  %v991_v7 = vld [vmem:[%s3625_s15 + $0x20] sm:$0xff]  ;;  %v992_v32 = vld [vmem:[%s3625_s15 + $0x28] sm:$0xff] }
 0x542   : > { %v1109_v41 = vadd.f32 %v3301_v48, %v991_v7  ;;  %v1114_v45 = vadd.f32 %v3299_v47, %v992_v32 }
 0x543   : > { %v1691_v8 = vmax.f32 %v1689_v3, 0.0  ;;  %v1692_v12 = vmax.f32 %v1690_v34, 0.0  ;;  %v993_v3 = vld [vmem:[%s3625_s15 + $0x30] sm:$0xff]  ;;  %v994_v34 = vld [vmem:[%s3625_s15 + $0x38] sm:$0xff] }
 0x544   : > { %v1119_v44 = vadd.f32 %v3305_v0, %v993_v3 }
 0x545   : > { %2384 = vmatprep.subr.msk.mxu1 %vm825_vm3, %v1692_v12 }
 0x546   : > { %2385 = vmatpush1.msk.msra.mxu1 %vm825_vm3, %v1691_v8  ;;  %v1124_v8 = vadd.f32 %v3303_v51, %v994_v34 }
 0x547   : > { %2386 = vmatmul.mubr.msk.f32.vlgmr.msra.gmra.mxu1 %vm821_vm4, %v2379_v15 }
 0x548   : > { %1790 = vmatprep.mubr.f32.mxu1 %v2779_v25 }
 0x54b   : > { %2387 = vmatmul.mubr.msk.f32.gmra.mxu1 %vm821_vm4, %v2380_v16 }
 0x54c   : > { %1796 = vmatprep.mubr.f32.mxu1 %v2779_v25 }
 0x54f   : > { %2388 = vmatmul.mubr.msk.f32.gmra.mxu1 %vm821_vm4, %v2381_v17 }
 0x550   : > { %1802 = vmatprep.mubr.f32.mxu1 %v2779_v25 }
 0x553   : > { %2389 = vmatmul.mubr.msk.f32.gmra.mxu1 %vm821_vm4, %v2382_v18 }
 0x554   : > { %1808 = vmatprep.mubr.f32.mxu1 %v2779_v25 }
 0x557   : > { %2390 = vmatmul.mubr.msk.f32.gmra.mxu1 %vm821_vm4, %v2383_v19 }
 0x607   : > { %v1786_v22 = vpop.f32.mrf.mxu1 }
 0x608   : > { %1815 = vrot.lane.b32.xlu0 %v1786_v22, %s3669_s21  ;;  %v1825_v24 = vrot.slane %v1786_v22, 4 }
 0x609   : > { %v1788_v23 = vpop.f32.mrf.mxu1 }
 0x60a   : > { %1817 = vrot.lane.b32.xlu1 %v1788_v23, %s3669_s21  ;;  %v1826_v27 = vrot.slane %v1788_v23, 4  ;;  %s3555_s21 = scalar_lea.hbm %s3626_s16, %s2401_s22 }
 0x60b   : > { %v1792_v26 = vpop.f32.mrf.mxu1 }
 0x60c   : > { %1829 = vrot.lane.b32.xlu0 %v1825_v24, %s3670_s20  ;;  %v1851_v29 = vrot.slane %v1792_v26, 4 }
 0x60d   : > { %v1794_v25 = vpop.f32.mrf.mxu1 }
 0x60e   : > { %1831 = vrot.lane.b32.xlu1 %v1826_v27, %s3670_s20  ;;  %v1852_v30 = vrot.slane %v1794_v25, 4 }
 0x60f   : > { %v3409_v28 = vpop.f32.mrf.mxu1 }
 0x610   : > { %1839 = vrot.lane.b32.xlu0 %v1792_v26, %s3671_s29  ;;  %v1869_v33 = vrot.slane %v3409_v28, 4 }
 0x611   : > { %v3414_v31 = vpop.f32.mrf.mxu1 }
 0x612   : > { %1841 = vrot.lane.b32.xlu1 %v1794_v25, %s3671_s29  ;;  %v1870_v35 = vrot.slane %v3414_v31, 4 }
 0x613   : > { %v1804_v36 = vpop.f32.mrf.mxu1 }
 0x614   : > { %1855 = vrot.lane.b32.xlu0 %v1851_v29, %s3672_s0  ;;  %v1895_v1 = vrot.slane %v1804_v36, 4 }
 0x615   : > { %v1806_v37 = vpop.f32.mrf.mxu1 }
 0x616   : > { %1857 = vrot.lane.b32.xlu1 %v1852_v30, %s3672_s0  ;;  %v1896_v63 = vrot.slane %v1806_v37, 4  ;;  %s2791_s0 = smov [#allocation10]  }
 0x617   : > { %v1810_v38 = vpop.f32.mrf.mxu1 }
 0x618   : > { %1873 = vrot.lane.b32.xlu0 %v1869_v33, %s3673_s1 }
 0x619   : > { %v1812_v39 = vpop.f32.mrf.mxu1 }
 0x61a   : > { %1875 = vrot.lane.b32.xlu1 %v1870_v35, %s3673_s1 }
 0x61c   : > { %1883 = vrot.lane.b32.xlu0 %v1804_v36, %s3666_s7 }
 0x61e   : > { %1885 = vrot.lane.b32.xlu1 %v1806_v37, %s3666_s7  ;;  %s2695_s7 = sshll.u32 %s2791_s0, 4  ;;  %s2696_s7 = int_to_ptr.vmem [resolvable:$false] %s2695_s7 }
 0x61f   : > { %s2697_s25 = scalar_lea.vmem %s2696_s7, 4096 }
 0x620   : > { %1899 = vrot.lane.b32.xlu0 %v1895_v1, %s3667_s19 }
 0x622   : > { %1901 = vrot.lane.b32.xlu1 %v1896_v63, %s3667_s19  ;;  %s572_s19 = sand.u32 1, %s2759_s24  }
 0x623   : > { %s2339_s30 = sshll.u32 %s572_s19, 7  ;;  %s3565_s20 = scalar_lea.sflag [#allocation7], %s572_s19 }
 0x624   : > { %1909 = vrot.lane.b32.xlu0 %v1810_v38, %s3674_s2  ;;  %s3523_s27 = scalar_lea.vmem [#allocation10], %s2339_s30 }
 0x625   : > { %s2227_s1 = sshll.u32 %s3523_s27, 4  ;;  %s3557_s1 = int_to_ptr.vmem [resolvable:$true] %s2227_s1 }
 0x626   : > { %1911 = vrot.lane.b32.xlu1 %v1812_v39, %s3674_s2  ;;  %s2691_s29 = scalar_lea.vmem %s3557_s1, 2048  ;;  %p2698_p0 = scmp.lt.s32.totalorder %s3557_s1, %s2696_s7 }
 0x627   : > { %p2692_p8 = scmp.ne.s32.totalorder %s3557_s1, %s2691_s29  ;;  %p2699_p6 = scmp.lt.s32.totalorder %s2697_s25, %s2691_s29 }
 0x628   : > { %1923 = vperm.xlu0 %2557, %v2391_v40  }
 0x629   : > { %p2693_p11 = pnand %p2692_p8, %p3675_p10  ;;  %p2700_p7 = por %p2699_p6, %p2698_p0 }
 0x62a   : > { %1934 = vperm.xlu1 %2558, %v1931_v53  }
 0x62b   : > { %p2694_p13 = pneg %p2693_p11 }
 0x62c   : > { %2031 = vperm.xlu0 %2557, %v1089_v57  }
 0x62d   : > { %p2701_p9 = pnand %p2700_p7, %p2694_p13 }
 0x62e   : > { %2036 = vperm.xlu1 %2558, %v1094_v60  }
 0x630   : > { %2041 = vperm.xlu0 %2557, %v1099_v5  }
 0x632   : > { %2046 = vperm.xlu1 %2558, %v1104_v43  }
 0x634   : > { %2051 = vperm.xlu0 %2557, %v1109_v41  }
 0x636   : > { %2056 = vperm.xlu1 %2558, %v1114_v45  }
 0x638   : > { %2061 = vperm.xlu0 %2557, %v1119_v44  }
 0x63a   : > { %2066 = vperm.xlu1 %2558, %v1124_v8  }
 0x67a   : > { %v1816_v48 = vpop.permute.xlu0 %1815 }
 0x67c   : > { %v1818_v12 = vpop.permute.xlu1 %1817 }
 0x67d   : > { %v1819_v51 = vsel %vm1274_vm6, %v1816_v48, %v1818_v12  ;;  %v1820_v24 = vsel %vm1274_vm6, %v1818_v12, %v1816_v48 }
 0x67e   : > { %v1830_v15 = vpop.permute.xlu0 %1829  ;;  %v1821_v36 = vmul.f32 %v1820_v24, %v3171_v6  ;;  %v1822_v37 = vmul.f32 %v1819_v51, %v3178_v9 }
 0x680   : > { %v1832_v16 = vpop.permute.xlu1 %1831 }
 0x681   : > { %v1833_v22 = vsel %vm1297_vm5, %v1830_v15, %v1832_v16  ;;  %v1834_v23 = vsel %vm1297_vm5, %v1832_v16, %v1830_v15 }
 0x682   : > { %v1840_v17 = vpop.permute.xlu0 %1839  ;;  %v1835_v25 = vmul.f32 %v1834_v23, %v3164_v62  ;;  %v1836_v29 = vmul.f32 %v1833_v22, %v3166_v4 }
 0x684   : > { %v1842_v18 = vpop.permute.xlu1 %1841  ;;  %v1837_v39 = vadd.f32 %v1835_v25, %v1821_v36  ;;  %v1838_v62 = vadd.f32 %v1836_v29, %v1822_v37 }
 0x685   : > { %v1843_v26 = vsel %vm1316_vm7, %v1840_v17, %v1842_v18  ;;  %v1844_v27 = vsel %vm1316_vm7, %v1842_v18, %v1840_v17 }
 0x686   : > { %v1856_v19 = vpop.permute.xlu0 %1855  ;;  %v1845_v1 = vmul.f32 %v1844_v27, %v3180_v10  ;;  %v1846_v63 = vmul.f32 %v1843_v26, %v3182_v11 }
 0x688   : > { %v1858_v47 = vpop.permute.xlu1 %1857  ;;  %v1847_v53 = vadd.f32 %v1845_v1, %v1837_v39  ;;  %v1848_v56 = vadd.f32 %v1846_v63, %v1838_v62 }
 0x689   : > { %v1859_v33 = vsel %vm1341_vm8, %v1856_v19, %v1858_v47  ;;  %v1860_v35 = vsel %vm1341_vm8, %v1858_v47, %v1856_v19 }
 0x68a   : > { %v1874_v0 = vpop.permute.xlu0 %1873  ;;  %v1861_v4 = vmul.f32 %v1860_v35, %v3195_v20  ;;  %v1862_v40 = vmul.f32 %v1859_v33, %v3197_v21 }
 0x68c   : > { %v1876_v30 = vpop.permute.xlu1 %1875  ;;  %v1863_v57 = vadd.f32 %v1861_v4, %v1847_v53  ;;  %v1864_v58 = vadd.f32 %v1862_v40, %v1848_v56 }
 0x68d   : > { %v1877_v9 = vsel %vm1368_vm9, %v1874_v0, %v1876_v30  ;;  %v1878_v10 = vsel %vm1368_vm9, %v1876_v30, %v1874_v0  ;;  %v1930_v0 = vld [vmem:[#allocation8] sm:$0x1] }
 0x68e   : > { %v1884_v38 = vpop.permute.xlu0 %1883  ;;  %v1865_v21 = vadd.f32 %v1863_v57, %v3409_v28  ;;  %v1866_v2 = vadd.f32 %v1864_v58, %v3414_v31  ;;  %v1879_v5 = vmul.f32 %v1877_v9, %v3212_v42  ;;  %v1880_v7 = vmul.f32 %v1878_v10, %v3215_v46 }
 0x690   : > { %v1886_v52 = vpop.permute.xlu1 %1885  ;;  %v1881_v31 = vadd.f32 %v1879_v5, %v1865_v21  ;;  %v1882_v46 = vadd.f32 %v1880_v7, %v1866_v2 }
 0x691   : > { %v1887_v11 = vsel %vm1387_vm10, %v1884_v38, %v1886_v52  ;;  %v1888_v20 = vsel %vm1387_vm10, %v1886_v52, %v1884_v38 }
 0x692   : > { %v1900_v60 = vpop.permute.xlu0 %1899  ;;  %v1889_v3 = vmul.f32 %v1887_v11, %v3222_v49  ;;  %v1890_v45 = vmul.f32 %v1888_v20, %v3224_v50 }
 0x694   : > { %v1902_v6 = vpop.permute.xlu1 %1901  ;;  %v1891_v48 = vadd.f32 %v1889_v3, %v1881_v31  ;;  %v1892_v12 = vadd.f32 %v1890_v45, %v1882_v46 }
 0x695   : > { %v1903_v32 = vsel %vm1412_vm11, %v1900_v60, %v1902_v6  ;;  %v1904_v41 = vsel %vm1412_vm11, %v1902_v6, %v1900_v60 }
 0x696   : > { %v1910_v34 = vpop.permute.xlu0 %1909  ;;  %v1905_v44 = vmul.f32 %v1903_v32, %v3231_v54  ;;  %v1906_v8 = vmul.f32 %v1904_v41, %v3233_v55 }
 0x698   : > { %v1912_v43 = vpop.permute.xlu1 %1911  ;;  %v1907_v50 = vadd.f32 %v1905_v44, %v1891_v48  ;;  %v1908_v16 = vadd.f32 %v1906_v8, %v1892_v12 }
 0x699   : > { %v1913_v28 = vsel %vm1431_vm12, %v1910_v34, %v1912_v43  ;;  %v1914_v42 = vsel %vm1431_vm12, %v1912_v43, %v1910_v34 }
 0x69a   : > { %v1915_v15 = vmul.f32 %v3251_v13, %v1913_v28  ;;  %v1916_v49 = vmul.f32 %v3256_v14, %v1914_v42 }
 0x69c   : > { %v1917_v17 = vadd.f32 %v1915_v15, %v1907_v50  ;;  %v1918_v18 = vadd.f32 %v1916_v49, %v1908_v16 }
 0x6a3   : > { %v1924_v19 = vpop.permute.xlu0 %1923 }
 0x6a4   : > { %v1926_v47 = vadd.f32 %v1924_v19, %v1917_v17  ;;  %v1927_v59 = vadd.f32 %v1924_v19, %v1918_v18 }
 0x6a5   : > { %v1935_v54 = vpop.permute.xlu1 %1934 }
 0x6a6   : > { %v1928_v22 = vmax.f32 %v1926_v47, 0.0  ;;  %v1929_v23 = vmax.f32 %v1927_v59, 0.0  ;;  %v1940_v24 = vrot.slane %v1935_v54, %v3153_v61 }
 0x6a7   : > { %v2032_v55 = vpop.permute.xlu0 %2031 }
 0x6a8   : > { %2392 = vmatprep.subr.msk.mxu0 %vm825_vm3, %v1929_v23 }
 0x6a9   : > { %2393 = vmatpush1.msk.msra.mxu0 %vm825_vm3, %v1928_v22  ;;  %v2037_v13 = vpop.permute.xlu1 %2036 }
 0x6aa   : > { %2394 = vmatmul.mubr.msk.f32.vlgmr.msra.gmra.mxu0 %vm821_vm4, %v1930_v0 }
 0x6ab   : > { %v2042_v14 = vpop.permute.xlu0 %2041 }
 0x6ad   : > { %v2047_v51 = vpop.permute.xlu1 %2046 }
 0x6af   : > { %v2052_v26 = vpop.permute.xlu0 %2051 }
 0x6b1   : > { %v2057_v27 = vpop.permute.xlu1 %2056 }
 0x6b3   : > { %v2062_v36 = vpop.permute.xlu0 %2061 }
 0x6b5   : > { %v2067_v37 = vpop.permute.xlu1 %2066 }
 0x76a   : > { %v2016_v25 = vpop.f32.mrf.mxu0 }
 0x76b   : > { %v2017_v29 = vadd.f32 %v2016_v25, %v1940_v24 }
 0x76c   : > { %v2018_v30 = vpop.f32.mrf.mxu0 }
 0x76d   : > { %v2024_v33 = vrot.slane %v2017_v29, %v3153_v61  ;;  %v2019_v35 = vadd.f32 %v2018_v30, %v1940_v24 }
 0x76f   : > { %v2069_v1 = vadd.f32 %v2032_v55, %v2024_v33  ;;  %v2071_v63 = vadd.f32 %v2037_v13, %v2024_v33  ;;  %v2073_v38 = vadd.f32 %v2042_v14, %v2024_v33  ;;  %v2075_v39 = vadd.f32 %v2047_v51, %v2024_v33 }
 0x770   : > { %v2077_v62 = vadd.f32 %v2052_v26, %v2024_v33  ;;  %v2079_v4 = vadd.f32 %v2057_v27, %v2024_v33  ;;  %v2081_v40 = vadd.f32 %v2062_v36, %v2024_v33  ;;  %v2083_v52 = vadd.f32 %v2067_v37, %v2024_v33 }
 0x771   : > { %v2085_v53 = vsub.f32 0.0, %v2069_v1  ;;  %v2087_v56 = vsub.f32 0.0, %v2071_v63  ;;  %v2089_v57 = vsub.f32 0.0, %v2073_v38  ;;  %v2091_v58 = vsub.f32 0.0, %v2075_v39 }
 0x772   : > { %v2093_v60 = vsub.f32 0.0, %v2077_v62  ;;  %v2095_v6 = vsub.f32 0.0, %v2079_v4  ;;  %v2097_v9 = vsub.f32 0.0, %v2081_v40  ;;  %v2099_v10 = vsub.f32 0.0, %v2083_v52 }
 0x773   : > { %v2101_v11 = vmul.f32 1.442695, %v2085_v53  ;;  %v2105_v20 = vmul.f32 1.442695, %v2087_v56  ;;  %v2109_v21 = vmul.f32 1.442695, %v2089_v57  ;;  %v2028_v2 = vrot.slane %v2019_v35, %v3153_v61 }
 0x774   : > { %v2113_v5 = vmul.f32 1.442695, %v2091_v58  ;;  %v2117_v7 = vmul.f32 1.442695, %v2093_v60  ;;  %v2121_v43 = vmul.f32 1.442695, %v2095_v6 }
 0x775   : > { %2559 = vpow2.f32 %v2101_v11  ;;  %v2125_v32 = vmul.f32 1.442695, %v2097_v9  ;;  %v2129_v41 = vmul.f32 1.442695, %v2099_v10  ;;  %v2070_v3 = vadd.f32 %v2032_v55, %v2028_v2 }
 0x776   : > { %2561 = vpow2.f32 %v2105_v20  ;;  %v2072_v45 = vadd.f32 %v2037_v13, %v2028_v2  ;;  %v2074_v34 = vadd.f32 %v2042_v14, %v2028_v2  ;;  %v2076_v28 = vadd.f32 %v2047_v51, %v2028_v2 }
 0x777   : > { %2563 = vpow2.f32 %v2109_v21  ;;  %v2078_v42 = vadd.f32 %v2052_v26, %v2028_v2  ;;  %v2080_v31 = vadd.f32 %v2057_v27, %v2028_v2  ;;  %v2082_v46 = vadd.f32 %v2062_v36, %v2028_v2 }
 0x778   : > { %2565 = vpow2.f32 %v2113_v5  ;;  %v2084_v44 = vadd.f32 %v2067_v37, %v2028_v2  ;;  %v2086_v8 = vsub.f32 0.0, %v2070_v3  ;;  %v2088_v48 = vsub.f32 0.0, %v2072_v45 }
 0x779   : > { %2567 = vpow2.f32 %v2117_v7  ;;  %v2090_v61 = vsub.f32 0.0, %v2074_v34  ;;  %v2092_v12 = vsub.f32 0.0, %v2076_v28  ;;  %v2094_v15 = vsub.f32 0.0, %v2078_v42  ;;  %v2624_v28 = vld [vmem:[%s2986_s18 + $0x10] sm:$0xff] }
 0x77a   : > { %2569 = vpow2.f32 %v2121_v43  ;;  %v2096_v49 = vsub.f32 0.0, %v2080_v31  ;;  %v2098_v50 = vsub.f32 0.0, %v2082_v46  ;;  %v2103_v16 = vmul.f32 1.442695, %v2086_v8 }
 0x77b   : > { %2571 = vpow2.f32 %v2125_v32  ;;  %v2107_v17 = vmul.f32 1.442695, %v2088_v48  ;;  %v2111_v18 = vmul.f32 1.442695, %v2090_v61  ;;  %v2100_v19 = vsub.f32 0.0, %v2084_v44  ;;  %v2625_v44 = vld [vmem:[%s2986_s18 + $0x20] sm:$0xff] }
 0x77c   : > { %2573 = vpow2.f32 %v2129_v41  ;;  %v2115_v47 = vmul.f32 1.442695, %v2092_v12  ;;  %v2119_v59 = vmul.f32 1.442695, %v2094_v15  ;;  %v2123_v22 = vmul.f32 1.442695, %v2096_v49 }
 0x77d   : > { %2575 = vpow2.f32 %v2103_v16  ;;  %v2127_v23 = vmul.f32 1.442695, %v2098_v50  ;;  %v2131_v0 = vmul.f32 1.442695, %v2100_v19  ;;  %v2623_v41 = vld [vmem:[%s2986_s18] sm:$0xff]  ;;  %v2626_v12 = vld [vmem:[%s2986_s18 + $0x30] sm:$0xff] }
 0x77e   : > { %2577 = vpow2.f32 %v2107_v17  ;;  %v2627_v16 = vld [vmem:[%s2986_s18 + $0x40] sm:$0xff] }
 0x77f   : > { %2579 = vpow2.f32 %v2111_v18 }
 0x780   : > { %2581 = vpow2.f32 %v2115_v47  ;;  %v2628_v47 = vld [vmem:[%s2986_s18 + $0x50] sm:$0xff] }
 0x781   : > { %2583 = vpow2.f32 %v2119_v59 }
 0x782   : > { %v2560_v54 = vpop.eup %2559  ;;  %2585 = vpow2.f32 %v2123_v22 }
 0x783   : > { %v2562_v55 = vpop.eup %2561  ;;  %v2133_v13 = vadd.f32 1.0, %v2560_v54  ;;  %2587 = vpow2.f32 %v2127_v23  ;;  %v2629_v23 = vld [vmem:[%s2986_s18 + $0x60] sm:$0xff] }
 0x784   : > { %v2564_v14 = vpop.eup %2563  ;;  %v2135_v51 = vadd.f32 1.0, %v2562_v55  ;;  %2589 = vpow2.f32 %v2131_v0 }
 0x785   : > { %v2566_v24 = vpop.eup %2565  ;;  %v2137_v26 = vadd.f32 1.0, %v2564_v14  ;;  %2591 = vrcp.f32 %v2133_v13  ;;  %v2630_v13 = vld [vmem:[%s2986_s18 + $0x70] sm:$0xff] }
 0x786   : > { %v2568_v27 = vpop.eup %2567  ;;  %v2139_v25 = vadd.f32 1.0, %v2566_v24  ;;  %2593 = vrcp.f32 %v2135_v51 }
 0x787   : > { %v2570_v29 = vpop.eup %2569  ;;  %v2141_v30 = vadd.f32 1.0, %v2568_v27  ;;  %2595 = vrcp.f32 %v2137_v26  ;;  %v2631_v27 = vld [vmem:[%s2986_s18 + $0x8] sm:$0xff] }
 0x788   : > { %v2572_v33 = vpop.eup %2571  ;;  %v2143_v35 = vadd.f32 1.0, %v2570_v29  ;;  %2597 = vrcp.f32 %v2139_v25 }
 0x789   : > { %v2574_v36 = vpop.eup %2573  ;;  %v2145_v37 = vadd.f32 1.0, %v2572_v33  ;;  %2599 = vrcp.f32 %v2141_v30  ;;  %v2632_v33 = vld [vmem:[%s2986_s18 + $0x18] sm:$0xff] }
 0x78a   : > { %v2576_v1 = vpop.eup %2575  ;;  %v2147_v63 = vadd.f32 1.0, %v2574_v36  ;;  %2601 = vrcp.f32 %v2143_v35 }
 0x78b   : > { %v2578_v38 = vpop.eup %2577  ;;  %2603 = vrcp.f32 %v2145_v37  ;;  %v2134_v39 = vadd.f32 1.0, %v2576_v1  ;;  %v2633_v1 = vld [vmem:[%s2986_s18 + $0x28] sm:$0xff] }
 0x78c   : > { %v2580_v62 = vpop.eup %2579  ;;  %2605 = vrcp.f32 %v2147_v63  ;;  %v2136_v4 = vadd.f32 1.0, %v2578_v38 }
 0x78d   : > { %v2582_v40 = vpop.eup %2581  ;;  %v2138_v52 = vadd.f32 1.0, %v2580_v62  ;;  %2607 = vrcp.f32 %v2134_v39  ;;  %v2634_v62 = vld [vmem:[%s2986_s18 + $0x38] sm:$0xff] }
 0x78e   : > { %v2584_v53 = vpop.eup %2583  ;;  %v2140_v56 = vadd.f32 1.0, %v2582_v40  ;;  %2609 = vrcp.f32 %v2136_v4 }
 0x78f   : > { %v2586_v57 = vpop.eup %2585  ;;  %v2142_v58 = vadd.f32 1.0, %v2584_v53  ;;  %2611 = vrcp.f32 %v2138_v52  ;;  %v2635_v53 = vld [vmem:[%s2986_s18 + $0x48] sm:$0xff] }
 0x790   : > { %v2588_v60 = vpop.eup %2587  ;;  %v2144_v6 = vadd.f32 1.0, %v2586_v57  ;;  %2613 = vrcp.f32 %v2140_v56 }
 0x791   : > { %v2590_v9 = vpop.eup %2589  ;;  %v2146_v10 = vadd.f32 1.0, %v2588_v60  ;;  %2615 = vrcp.f32 %v2142_v58  ;;  %v2636_v58 = vld [vmem:[%s2986_s18 + $0x58] sm:$0xff] }
 0x792   : > { %v2592_v11 = vpop.eup %2591  ;;  %v2148_v20 = vadd.f32 1.0, %v2590_v9  ;;  %2617 = vrcp.f32 %v2144_v6  ;;  %v2637_v6 = vld [vmem:[%s2986_s18 + $0x68] sm:$0xff] }
 0x793   : > { %v2594_v21 = vpop.eup %2593  ;;  %v2165_v2 = vadd.f32 1.0, %v2592_v11  ;;  %2619 = vrcp.f32 %v2146_v10  ;;  %v2638_v10 = vld [vmem:[%s2986_s18 + $0x78] sm:$0xff] }
 0x794   : > { %v2596_v5 = vpop.eup %2595  ;;  %v2167_v7 = vadd.f32 1.0, %v2594_v21  ;;  %2621 = vrcp.f32 %v2148_v20 }
 0x795   : > { %v2598_v43 = vpop.eup %2597  ;;  %v2169_v32 = vadd.f32 1.0, %v2596_v5  ;;  %v2181_v3 = vmul.f32 %v2623_v41, %v2165_v2 }
 0x796   : > { %v2600_v45 = vpop.eup %2599  ;;  %v2171_v34 = vadd.f32 1.0, %v2598_v43  ;;  %v2183_v42 = vmul.f32 %v2624_v28, %v2167_v7 }
 0x797   : > { %v2602_v31 = vpop.eup %2601  ;;  %v2173_v46 = vadd.f32 1.0, %v2600_v45  ;;  %v2185_v8 = vmul.f32 %v2625_v44, %v2169_v32  ;;  %2197 = vst [vmem:[%s3523_s27] sm:$0xff] %v2181_v3 }
 0x798   : > { %v2604_v48 = vpop.eup %2603  ;;  %v2175_v61 = vadd.f32 1.0, %v2602_v31  ;;  %v2187_v15 = vmul.f32 %v2626_v12, %v2171_v34  ;;  %2199 = vst [vmem:[%s3523_s27 + $0x10] sm:$0xff] %v2183_v42 }
 0x799   : > { %v2606_v49 = vpop.eup %2605  ;;  %v2177_v50 = vadd.f32 1.0, %v2604_v48  ;;  %v2189_v17 = vmul.f32 %v2627_v16, %v2173_v46  ;;  %2201 = vst [vmem:[%s3523_s27 + $0x20] sm:$0xff] %v2185_v8 }
 0x79a   : > { %v2608_v18 = vpop.eup %2607  ;;  %v2179_v19 = vadd.f32 1.0, %v2606_v49  ;;  %v2191_v59 = vmul.f32 %v2628_v47, %v2175_v61  ;;  %2203 = vst [vmem:[%s3523_s27 + $0x30] sm:$0xff] %v2187_v15 }
 0x79b   : > { %v2610_v22 = vpop.eup %2609  ;;  %v2193_v0 = vmul.f32 %v2629_v23, %v2177_v50  ;;  %2205 = vst [vmem:[%s3523_s27 + $0x40] sm:$0xff] %v2189_v17  ;;  %v2166_v54 = vadd.f32 1.0, %v2608_v18 }
 0x79c   : > { %v2612_v55 = vpop.eup %2611  ;;  %v2195_v14 = vmul.f32 %v2630_v13, %v2179_v19  ;;  %2207 = vst [vmem:[%s3523_s27 + $0x50] sm:$0xff] %v2191_v59  ;;  %v2168_v51 = vadd.f32 1.0, %v2610_v22 }
 0x79d   : > { %v2614_v24 = vpop.eup %2613  ;;  %2209 = vst [vmem:[%s3523_s27 + $0x60] sm:$0xff] %v2193_v0  ;;  %v2170_v26 = vadd.f32 1.0, %v2612_v55  ;;  %v2182_v25 = vmul.f32 %v2631_v27, %v2166_v54 }
 0x79e   : > { %v2616_v29 = vpop.eup %2615  ;;  %2211 = vst [vmem:[%s3523_s27 + $0x70] sm:$0xff] %v2195_v14  ;;  %v2172_v30 = vadd.f32 1.0, %v2614_v24  ;;  %v2184_v35 = vmul.f32 %v2632_v33, %v2168_v51 }
 0x79f   : > { %v2618_v36 = vpop.eup %2617  ;;  %v2174_v37 = vadd.f32 1.0, %v2616_v29  ;;  %v2186_v63 = vmul.f32 %v2633_v1, %v2170_v26  ;;  %2198 = vst [vmem:[%s3523_s27 + $0x8] sm:$0xff] %v2182_v25 }
 0x7a0   : > { %v2620_v38 = vpop.eup %2619  ;;  %v2176_v39 = vadd.f32 1.0, %v2618_v36  ;;  %v2188_v4 = vmul.f32 %v2634_v62, %v2172_v30  ;;  %2200 = vst [vmem:[%s3523_s27 + $0x18] sm:$0xff] %v2184_v35 }
 0x7a1   : > { %v2622_v40 = vpop.eup %2621  ;;  %v2178_v52 = vadd.f32 1.0, %v2620_v38  ;;  %v2190_v56 = vmul.f32 %v2635_v53, %v2174_v37  ;;  %2202 = vst [vmem:[%s3523_s27 + $0x28] sm:$0xff] %v2186_v63 }
 0x7a2   : > { %v2180_v57 = vadd.f32 1.0, %v2622_v40  ;;  %v2192_v60 = vmul.f32 %v2636_v58, %v2176_v39  ;;  %2204 = vst [vmem:[%s3523_s27 + $0x38] sm:$0xff] %v2188_v4 }
 0x7a3   : > { %v2194_v9 = vmul.f32 %v2637_v6, %v2178_v52  ;;  %2206 = vst [vmem:[%s3523_s27 + $0x48] sm:$0xff] %v2190_v56 }
 0x7a4   : > { %v2196_v11 = vmul.f32 %v2638_v10, %v2180_v57  ;;  %2208 = vst [vmem:[%s3523_s27 + $0x58] sm:$0xff] %v2192_v60 }
 0x7a5   : > { %2210 = vst [vmem:[%s3523_s27 + $0x68] sm:$0xff] %v2194_v9 }
 0x7a6   : > { %2212 = vst [vmem:[%s3523_s27 + $0x78] sm:$0xff] %v2196_v11 }
 0x7a7   : > { %2704 = shalt.err (!%p2701_p9)
}
 0x7a8   : > { %s2705_s18 = scalar_lea.hbm %s3555_s21, 2048  ;;  %s2709_s27 = scalar_lea.hbm %s3626_s16, 4096 }
 0x7a9   : > { %p2706_p12 = scmp.ne.s32.totalorder %s3555_s21, %s2705_s18  ;;  %p2710_p5 = scmp.lt.s32.totalorder %s3555_s21, %s3626_s16 }
 0x7aa   : > { %p2711_p3 = scmp.lt.s32.totalorder %s2709_s27, %s2705_s18 }
 0x7ab   : > { %p2707_p1 = pnand %p2706_p12, %p3675_p10 }
 0x7ac   : > { %p2712_p4 = por %p2711_p3, %p2710_p5 }
 0x7ad   : > { %p2708_p2 = pneg %p2707_p1 }
 0x7af   : > { %p2713_p8 = pnand %p2712_p4, %p2708_p2 }
 0x7b1   : > { %2716 = shalt.err (!%p2713_p8)
}
 0x7b2   : > { %s2792_s2 = smov 256   ;;  %s2793_s29 = smov 16  }
 0x7b3   : > { %2475 = dma.vmem_to_hbm [thread:$0]  (%p3675_p10), %s3557_s1, 2048, %s3555_s21, %s3565_s20, %s2792_s2, %s2792_s2, %s2793_s29  }
 0x7b4 PF: > { %s3676_s0 = sld [smem:[#allocation17_spill]]  ;;  %p2492_p11 = scmp.ge.s32.totalorder %s2775_s28, 2 }
 0x7b5   : > { %s2242_s7 = sand.u32 1, %s2755_s23  }
 0x7b6   : > { %s2243_s25 = scalar_lea.sflag [#allocation7], %s2242_s7 }
 0x7ba   : > { %p3677_p13 = scmp.ne.s32.totalorder %s3676_s0, 0 }
 0x7bc   : > { %p2485_p0 = pnand %p2492_p11, %p3677_p13 }
 0x7be   : > { %p2486_p6 = pneg %p2485_p0 }
 0x7c0   : > { %2750 = dma.done.wait (%p2486_p6), %s2243_s25, 2048  }
 0x7c1   : > { %2752 = vsyncadd (%p2486_p6), %s2243_s25, 4294965248  ;;  %s33_s28 = sadd.s32 1, %s2775_s28   ;;  %s3678_s18 = sld [smem:[#allocation14_spill]] }
 0x7c2   : > { %p30_p7 = scmp.ge.s32.totalorder %s33_s28, 4   ;;  %s3679_s25 = sld [smem:[#allocation18_spill]] }
 0x7c3   : > { %s3680_s26 = sld [smem:[#allocation15_spill]]  ;;  %s3682_s23 = smov %s2759_s24 }
 0x7c4   : > { %s3681_s27 = sld [smem:[#allocation16_spill]]  ;;  %32 = sbr.rel (!%p30_p7) target bundleno = 10 (0xa), region = 141 }
 0x7c7   : > { %s3683_s24 = smov %s3678_s18 }
 0x7c9   :  { %2248 = vsyncpa [#allocation6], 1 }
 0x7ca   :  { %2250 = vsyncpa [#allocation6 + $0x1], 1 }
 0x7cb   :  { %2251 = vsyncpa [#allocation9], 1 }
 0x7cc   :  { %2252 = vsyncpa [#allocation7], 1 }
 0x7cd   :  { %2254 = vsyncpa [#allocation7 + $0x1], 1 }

</bundles_post_ra>
